<compile_context>
chip_gen: v6e
topology: v6e:2x2x1
jax: 0.10.0
libtpu: 0.0.40
codegen_flags: <defaults>
</compile_context>

<pallas_src>
import functools

import numpy as np

import jax
import jax.numpy as jnp
from jax.experimental import pallas as pl
from jax.experimental.pallas import tpu as pltpu

# Flip to jnp.bfloat16 to halve streamed DMA bytes / double MXU rate (accumulation
# stays f32 via preferred_element_type); kept f32 for exact parity with the model.
MXU_IN_DTYPE = jnp.float32


def _round_up(x, m):
    return (x + m - 1) // m * m


def _pad2d(x, rows, cols):
    r, c = x.shape
    if r == rows and c == cols:
        return x
    return jnp.pad(x, ((0, rows - r), (0, cols - c)))


def _pick_tile_m(m, tile_m):
    """Row tile for the fc matmul: multiple of 8, >=2 grid steps when possible."""
    mp8 = _round_up(m, 8)
    tm = min(tile_m, mp8)
    if mp8 // tm < 2 and mp8 >= 16:          # keep both v7x TensorCores busy
        tm = _round_up(mp8 // 2, 8)
    return tm, _round_up(m, tm)


def _pick_tile_b(b, max_tile):
    """Batch tile for the conv kernels: >=2 grid steps when possible."""
    t = min(max_tile, b)
    if b // t < 2 and b >= 2:
        t = (b + 1) // 2
    return t, _round_up(b, t)


# ----------------------------------------------------------------------------
# Pallas kernels
# ----------------------------------------------------------------------------
def _conv_relu_pool_kernel(x_ref, m_ref, b_ref, o_ref, *, t_imgs, hs, kh, n_cols,
                           ph_out):
    # x_ref: [t_imgs*2*hs, K]  rows = (image, H-parity, H//2), lanes = W*C (w-major)
    # m_ref: [K, kh*n_cols]    banded tap matrix, cols = (tap row i, W-parity s,
    #                          pooled col pw, out chan oc)
    # One MXU matmul gives every tap-row contribution for every input row.
    y = jnp.dot(x_ref[...], m_ref[...], preferred_element_type=jnp.float32)
    y = y.reshape(t_imgs, 2, hs, kh * n_cols)

    # Shifted-row accumulation: conv output row (2*ph + r) pulls tap row i from
    # input row (2*ph + r + i)  ->  parity (r+i)%2, row offset (r+i)//2.
    conv = []
    for r in range(2):
        acc = None
        for i in range(kh):
            p = (r + i) % 2
            d = (r + i) // 2
            term = y[:, p, d:d + ph_out, i * n_cols:(i + 1) * n_cols]
            acc = term if acc is None else acc + term
        conv.append(acc)

    pooled = jnp.maximum(conv[0], conv[1])                         # 2x2 pool: H pairs
    half = n_cols // 2
    pooled = jnp.maximum(pooled[..., :half], pooled[..., half:])   # 2x2 pool: W pairs
    o_ref[...] = jnp.maximum(pooled + b_ref[...], 0.0).astype(o_ref.dtype)


def _fc_stack_kernel(x_ref, w1_ref, b1_ref, w2_ref, b2_ref, w3_ref, b3_ref, o_ref):
    # fc1 -> ReLU -> fc2 -> ReLU -> fc3, all (padded) weights VMEM-resident.
    h = jnp.dot(x_ref[...], w1_ref[...], preferred_element_type=jnp.float32) + b1_ref[...]
    h = jnp.maximum(h, 0.0)
    h = jnp.dot(h.astype(w2_ref.dtype), w2_ref[...],
                preferred_element_type=jnp.float32) + b2_ref[...]
    h = jnp.maximum(h, 0.0)
    h = jnp.dot(h.astype(w3_ref.dtype), w3_ref[...],
                preferred_element_type=jnp.float32) + b3_ref[...]
    o_ref[...] = h.astype(o_ref.dtype)


# ----------------------------------------------------------------------------
# Conv wrapper (valid conv, stride 1, + bias + ReLU + 2x2/2 max pool, fused)
# ----------------------------------------------------------------------------
def _build_conv_matrices(w, b, w_in):
    """Banded tap matrix + pooled bias row.

    Mcat[(w_in*C + c), (i, s, pw, oc)] = w[oc, c, i, (w_in - 2*pw - s)] (0 if out of
    band) -- each entry is an exact copy of one weight, so no precision is lost.
    """
    oc, c_in, kh, kw = w.shape
    ow = w_in - kw + 1
    pw = ow // 2
    sel = np.zeros((w_in, kw, 2, pw), np.float32)
    for j in range(kw):
        for s in range(2):
            for q in range(pw):
                sel[2 * q + s + j, j, s, q] = 1.0
    m = jnp.einsum('ocij,wjsq->iwcsqo', w.astype(jnp.float32), jnp.asarray(sel))
    m = m.reshape(kh, w_in * c_in, 2 * pw * oc)
    m = jnp.transpose(m, (1, 0, 2)).reshape(w_in * c_in, kh * 2 * pw * oc)
    bias = jnp.broadcast_to(b.reshape(1, 1, 1, oc), (1, 1, pw, oc)).reshape(1, 1, pw * oc)
    return m.astype(MXU_IN_DTYPE), bias.astype(jnp.float32)


def conv_relu_pool(x_nhwc, w, b, *, max_tile_b=32):
    """x_nhwc: [B, H, W, C]; w: [OC, C, kh, kw] (PyTorch OIHW); b: [OC].

    Returns [B, OH//2, (OW//2)*OC] with lane order (pooled col, out channel).
    """
    bsz, h, wdim, c = x_nhwc.shape
    oc, c2, kh, kw = w.shape
    assert c == c2
    oh, ow = h - kh + 1, wdim - kw + 1
    assert h % 2 == 0 and oh % 2 == 0 and ow % 2 == 0
    ph, pw = oh // 2, ow // 2
    k = wdim * c
    n_cols = 2 * pw * oc

    hh = h // 2
    hs = _round_up(hh, 8)
    t, bp = _pick_tile_b(bsz, max_tile_b)

    # Split rows by H parity (single cheap XLA pass), pad the half-height to a
    # sublane multiple and the batch to the tile, then flatten rows for the kernel.
    xs = x_nhwc.reshape(bsz, hh, 2, k).transpose(0, 2, 1, 3)        # [B, 2, hh, W*C]
    xs = jnp.pad(xs, ((0, bp - bsz), (0, 0), (0, hs - hh), (0, 0)))
    xs = xs.reshape(bp * 2 * hs, k).astype(MXU_IN_DTYPE)

    m_mat, bias = _build_conv_matrices(w, b, wdim)

    rows = t * 2 * hs
    out = pl.pallas_call(
        functools.partial(_conv_relu_pool_kernel, t_imgs=t, hs=hs, kh=kh,
                          n_cols=n_cols, ph_out=ph),
        out_shape=jax.ShapeDtypeStruct((bp, ph, pw * oc), jnp.float32),
        grid=(bp // t,),
        in_specs=[
            pl.BlockSpec((rows, k), lambda i: (i, 0)),
            pl.BlockSpec((k, kh * n_cols), lambda i: (0, 0)),      # VMEM-resident
            pl.BlockSpec((1, 1, pw * oc), lambda i: (0, 0, 0)),
        ],
        out_specs=pl.BlockSpec((t, ph, pw * oc), lambda i: (i, 0, 0)),
        compiler_params=pltpu.CompilerParams(dimension_semantics=("parallel",)),
    )(xs, m_mat, bias)
    return out[:bsz]


# ----------------------------------------------------------------------------
# Fused fully-connected stack
# ----------------------------------------------------------------------------
def fc_stack(x, w1, b1, w2, b2, w3, b3, *, tile_m=1024):
    """Fused fc1->ReLU->fc2->ReLU->fc3.  x: [M, K1]; w_i: PyTorch [out, in]."""
    m, k1 = x.shape
    n1, n2, n3 = w1.shape[0], w2.shape[0], w3.shape[0]
    k1p = _round_up(k1, 128)
    n1p, n2p, n3p = (_round_up(n, 128) for n in (n1, n2, n3))
    tm, mp = _pick_tile_m(m, tile_m)

    x_p = _pad2d(x.astype(MXU_IN_DTYPE), mp, k1p)
    w1p = _pad2d(w1.T.astype(MXU_IN_DTYPE), k1p, n1p)
    w2p = _pad2d(w2.T.astype(MXU_IN_DTYPE), n1p, n2p)
    w3p = _pad2d(w3.T.astype(MXU_IN_DTYPE), n2p, n3p)
    b1p = _pad2d(b1.reshape(1, -1).astype(jnp.float32), 1, n1p)
    b2p = _pad2d(b2.reshape(1, -1).astype(jnp.float32), 1, n2p)
    b3p = _pad2d(b3.reshape(1, -1).astype(jnp.float32), 1, n3p)

    out = pl.pallas_call(
        _fc_stack_kernel,
        out_shape=jax.ShapeDtypeStruct((mp, n3p), jnp.float32),
        grid=(mp // tm,),
        in_specs=[
            pl.BlockSpec((tm, k1p), lambda i: (i, 0)),
            pl.BlockSpec((k1p, n1p), lambda i: (0, 0)),
            pl.BlockSpec((1, n1p), lambda i: (0, 0)),
            pl.BlockSpec((n1p, n2p), lambda i: (0, 0)),
            pl.BlockSpec((1, n2p), lambda i: (0, 0)),
            pl.BlockSpec((n2p, n3p), lambda i: (0, 0)),
            pl.BlockSpec((1, n3p), lambda i: (0, 0)),
        ],
        out_specs=pl.BlockSpec((tm, n3p), lambda i: (i, 0)),
        compiler_params=pltpu.CompilerParams(dimension_semantics=("parallel",)),
    )(x_p, w1p, b1p, w2p, b2p, w3p, b3p)
    return out[:m, :n3]


# ----------------------------------------------------------------------------
# Parameters (deterministic, PyTorch-style uniform(+-1/sqrt(fan_in)) init)
# ----------------------------------------------------------------------------
def init_params(key):
    def uniform(key, shape, fan_in):
        bound = 1.0 / jnp.sqrt(jnp.float32(fan_in))
        return jax.random.uniform(key, shape, jnp.float32, -bound, bound)

    keys = jax.random.split(key, 10)
    p = {}
    p["conv1_w"] = uniform(keys[0], (6, 3, 5, 5), 3 * 5 * 5)
    p["conv1_b"] = uniform(keys[1], (6,), 3 * 5 * 5)
    p["conv2_w"] = uniform(keys[2], (16, 6, 5, 5), 6 * 5 * 5)
    p["conv2_b"] = uniform(keys[3], (16,), 6 * 5 * 5)
    p["fc1_w"] = uniform(keys[4], (120, 16 * 5 * 5), 16 * 5 * 5)   # [out, in]
    p["fc1_b"] = uniform(keys[5], (120,), 16 * 5 * 5)
    p["fc2_w"] = uniform(keys[6], (84, 120), 120)
    p["fc2_b"] = uniform(keys[7], (84,), 120)
    p["fc3_w"] = uniform(keys[8], (10, 84), 84)
    p["fc3_b"] = uniform(keys[9], (10,), 84)
    return p


# ----------------------------------------------------------------------------
# Forward pass (mirrors ConvNet.forward exactly)
# ----------------------------------------------------------------------------
@jax.jit
def convnet_forward(x, params):
    bsz = x.shape[0]
    x = jnp.transpose(x, (0, 2, 3, 1))                                   # NCHW -> NHWC

    y = conv_relu_pool(x, params["conv1_w"], params["conv1_b"])          # [B, 14, 14*6]
    y = conv_relu_pool(y.reshape(bsz, 14, 14, 6),
                       params["conv2_w"], params["conv2_b"])             # [B, 5, 5*16]

    # torch.flatten(x, 1) flattens NCHW -> (C, H, W); our features are (H, W, C),
    # so permute fc1's input features instead of the activations.
    feats = y.reshape(bsz, 5 * 5 * 16)
    fc1_w_hwc = params["fc1_w"].reshape(120, 16, 5, 5).transpose(0, 2, 3, 1).reshape(120, 400)
    return fc_stack(feats, fc1_w_hwc, params["fc1_b"],
                    params["fc2_w"], params["fc2_b"],
                    params["fc3_w"], params["fc3_b"])                     # [B, 10]


# ----------------------------------------------------------------------------
# Pure-JAX reference (structural correctness check)
# ----------------------------------------------------------------------------
@jax.jit
def _reference_forward(x, params):
    hi = jax.lax.Precision.HIGHEST
    y = jax.lax.conv_general_dilated(x, params["conv1_w"], (1, 1), "VALID",
                                     dimension_numbers=("NCHW", "OIHW", "NCHW"),
                                     precision=hi)
    y = jax.nn.relu(y + params["conv1_b"][None, :, None, None])
    y = jax.lax.reduce_window(y, -jnp.inf, jax.lax.max, (1, 1, 2, 2), (1, 1, 2, 2), "VALID")
    y = jax.lax.conv_general_dilated(y, params["conv2_w"], (1, 1), "VALID",
                                     dimension_numbers=("NCHW", "OIHW", "NCHW"),
                                     precision=hi)
    y = jax.nn.relu(y + params["conv2_b"][None, :, None, None])
    y = jax.lax.reduce_window(y, -jnp.inf, jax.lax.max, (1, 1, 2, 2), (1, 1, 2, 2), "VALID")
    y = y.reshape(y.shape[0], -1)
    y = jax.nn.relu(jnp.dot(y, params["fc1_w"].T, precision=hi) + params["fc1_b"])
    y = jax.nn.relu(jnp.dot(y, params["fc2_w"].T, precision=hi) + params["fc2_b"])
    return jnp.dot(y, params["fc3_w"].T, precision=hi) + params["fc3_b"]


if __name__ == "__main__":
    key = jax.random.PRNGKey(0)
    k_x, k_p = jax.random.split(key)
    # fc1 expects 16*5*5 features, which forces 32x32 spatial input with 3 channels.
    x = jax.random.normal(k_x, (2, 3, 32, 32), jnp.float32)
    params = init_params(k_p)

    out = jax.block_until_ready(convnet_forward(x, params))
    assert out.shape == (2, 10), out.shape
    assert out.dtype == jnp.float32

    ref = jax.block_until_ready(_reference_forward(x, params))
    err = float(jnp.max(jnp.abs(out - ref)))
    tol = 2e-2 * (1.0 + float(jnp.max(jnp.abs(ref))))
    assert err < tol, f"mismatch vs reference: max|diff|={err:.3e} tol={tol:.3e}"

    print("KERNEL_OK")
</pallas_src>

<mosaic_0001>
module attributes {stable_mosaic.version = 11 : i64} {
  func.func @_conv_relu_pool_kernel(%arg0: i32, %arg1: memref<32x96xf32, #tpu.memory_space<vmem>>, %arg2: memref<96x840xf32, #tpu.memory_space<vmem>>, %arg3: memref<1x1x84xf32, #tpu.memory_space<vmem>>, %arg4: memref<1x14x84xf32, #tpu.memory_space<vmem>>) attributes {dimension_semantics = [#tpu.dimension_semantics<parallel>], iteration_bounds = array<i64: 2>, scalar_prefetch = 0 : i64, scratch_operands = 0 : i64, tpu.core_type = #tpu.core_type<tc>, window_params = [{transform_indices = @transform_0, window_bounds = array<i64: 32, 96>}, {pipeline_mode = #tpu.pipeline_mode<synchronous>, transform_indices = @transform_1, window_bounds = array<i64: 96, 840>}, {pipeline_mode = #tpu.pipeline_mode<synchronous>, transform_indices = @transform_2, window_bounds = array<i64: 1, 1, 84>}, {transform_indices = @transform_3, window_bounds = array<i64: 1, 14, 84>}]} {
    %c0 = arith.constant 0 : index
    %c0_0 = arith.constant 0 : index
    %0 = vector.load %arg1[%c0, %c0_0] : memref<32x96xf32, #tpu.memory_space<vmem>>, vector<32x96xf32>
    %c0_1 = arith.constant 0 : index
    %c0_2 = arith.constant 0 : index
    %1 = vector.load %arg2[%c0_1, %c0_2] : memref<96x840xf32, #tpu.memory_space<vmem>>, vector<96x840xf32>
    %cst = arith.constant dense<0.000000e+00> : vector<32x840xf32>
    %2 = tpu.matmul %0, %1, %cst {dimension_numbers = #tpu.dot_dimension_numbers<[1], [0], [0], [1], [0, 0, 1, 1], [], []>} : vector<32x96xf32>, vector<96x840xf32>, vector<32x840xf32> -> vector<32x840xf32>
    %3 = vector.shape_cast %2 : vector<32x840xf32> to vector<1x2x16x840xf32>
    %4 = vector.extract_strided_slice %3 {offsets = [0, 0, 0, 0], sizes = [1, 1, 14, 168], strides = [1, 1, 1, 1]} : vector<1x2x16x840xf32> to vector<1x1x14x168xf32>
    %5 = vector.shape_cast %4 : vector<1x1x14x168xf32> to vector<1x14x168xf32>
    %6 = vector.extract_strided_slice %3 {offsets = [0, 1, 0, 168], sizes = [1, 1, 14, 168], strides = [1, 1, 1, 1]} : vector<1x2x16x840xf32> to vector<1x1x14x168xf32>
    %7 = vector.shape_cast %6 : vector<1x1x14x168xf32> to vector<1x14x168xf32>
    %8 = arith.addf %5, %7 : vector<1x14x168xf32>
    %9 = vector.extract_strided_slice %3 {offsets = [0, 0, 1, 336], sizes = [1, 1, 14, 168], strides = [1, 1, 1, 1]} : vector<1x2x16x840xf32> to vector<1x1x14x168xf32>
    %10 = vector.shape_cast %9 : vector<1x1x14x168xf32> to vector<1x14x168xf32>
    %11 = arith.addf %8, %10 : vector<1x14x168xf32>
    %12 = vector.extract_strided_slice %3 {offsets = [0, 1, 1, 504], sizes = [1, 1, 14, 168], strides = [1, 1, 1, 1]} : vector<1x2x16x840xf32> to vector<1x1x14x168xf32>
    %13 = vector.shape_cast %12 : vector<1x1x14x168xf32> to vector<1x14x168xf32>
    %14 = arith.addf %11, %13 : vector<1x14x168xf32>
    %15 = vector.extract_strided_slice %3 {offsets = [0, 0, 2, 672], sizes = [1, 1, 14, 168], strides = [1, 1, 1, 1]} : vector<1x2x16x840xf32> to vector<1x1x14x168xf32>
    %16 = vector.shape_cast %15 : vector<1x1x14x168xf32> to vector<1x14x168xf32>
    %17 = arith.addf %14, %16 : vector<1x14x168xf32>
    %18 = vector.extract_strided_slice %3 {offsets = [0, 1, 0, 0], sizes = [1, 1, 14, 168], strides = [1, 1, 1, 1]} : vector<1x2x16x840xf32> to vector<1x1x14x168xf32>
    %19 = vector.shape_cast %18 : vector<1x1x14x168xf32> to vector<1x14x168xf32>
    %20 = vector.extract_strided_slice %3 {offsets = [0, 0, 1, 168], sizes = [1, 1, 14, 168], strides = [1, 1, 1, 1]} : vector<1x2x16x840xf32> to vector<1x1x14x168xf32>
    %21 = vector.shape_cast %20 : vector<1x1x14x168xf32> to vector<1x14x168xf32>
    %22 = arith.addf %19, %21 : vector<1x14x168xf32>
    %23 = vector.extract_strided_slice %3 {offsets = [0, 1, 1, 336], sizes = [1, 1, 14, 168], strides = [1, 1, 1, 1]} : vector<1x2x16x840xf32> to vector<1x1x14x168xf32>
    %24 = vector.shape_cast %23 : vector<1x1x14x168xf32> to vector<1x14x168xf32>
    %25 = arith.addf %22, %24 : vector<1x14x168xf32>
    %26 = vector.extract_strided_slice %3 {offsets = [0, 0, 2, 504], sizes = [1, 1, 14, 168], strides = [1, 1, 1, 1]} : vector<1x2x16x840xf32> to vector<1x1x14x168xf32>
    %27 = vector.shape_cast %26 : vector<1x1x14x168xf32> to vector<1x14x168xf32>
    %28 = arith.addf %25, %27 : vector<1x14x168xf32>
    %29 = vector.extract_strided_slice %3 {offsets = [0, 1, 2, 672], sizes = [1, 1, 14, 168], strides = [1, 1, 1, 1]} : vector<1x2x16x840xf32> to vector<1x1x14x168xf32>
    %30 = vector.shape_cast %29 : vector<1x1x14x168xf32> to vector<1x14x168xf32>
    %31 = arith.addf %28, %30 : vector<1x14x168xf32>
    %32 = arith.maximumf %17, %31 : vector<1x14x168xf32>
    %33 = vector.extract_strided_slice %32 {offsets = [0, 0, 0], sizes = [1, 14, 84], strides = [1, 1, 1]} : vector<1x14x168xf32> to vector<1x14x84xf32>
    %34 = vector.extract_strided_slice %32 {offsets = [0, 0, 84], sizes = [1, 14, 84], strides = [1, 1, 1]} : vector<1x14x168xf32> to vector<1x14x84xf32>
    %35 = arith.maximumf %33, %34 : vector<1x14x84xf32>
    %c0_3 = arith.constant 0 : index
    %c0_4 = arith.constant 0 : index
    %c0_5 = arith.constant 0 : index
    %36 = vector.load %arg3[%c0_3, %c0_4, %c0_5] : memref<1x1x84xf32, #tpu.memory_space<vmem>>, vector<1x1x84xf32>
    %37 = vector.broadcast %36 : vector<1x1x84xf32> to vector<1x14x84xf32>
    %38 = arith.addf %35, %37 : vector<1x14x84xf32>
    %cst_6 = arith.constant 0.000000e+00 : f32
    %39 = vector.broadcast %cst_6 : f32 to vector<1x14x84xf32>
    %40 = arith.maximumf %38, %39 : vector<1x14x84xf32>
    %c0_7 = arith.constant 0 : index
    %c0_8 = arith.constant 0 : index
    %c0_9 = arith.constant 0 : index
    %41 = vector.load %arg4[%c0_7, %c0_8, %c0_9] : memref<1x14x84xf32, #tpu.memory_space<vmem>>, vector<1x14x84xf32>
    tpu.vector_store %arg4[%c0_7, %c0_8, %c0_9], %40 {strides = array<i32>} : memref<1x14x84xf32, #tpu.memory_space<vmem>>, vector<1x14x84xf32>,
    return
  }
  func.func @transform_0(%arg0: i32) -> (i32, i32) {
    %c0_i32 = arith.constant 0 : i32
    %c0_i32_0 = arith.constant 0 : i32
    return %arg0, %c0_i32 : i32, i32
  }
  func.func @transform_1(%arg0: i32) -> (i32, i32) {
    %c0_i32 = arith.constant 0 : i32
    %c0_i32_0 = arith.constant 0 : i32
    %c0_i32_1 = arith.constant 0 : i32
    return %c0_i32, %c0_i32_0 : i32, i32
  }
  func.func @transform_2(%arg0: i32) -> (i32, i32, i32) {
    %c0_i32 = arith.constant 0 : i32
    %c0_i32_0 = arith.constant 0 : i32
    %c0_i32_1 = arith.constant 0 : i32
    %c0_i32_2 = arith.constant 0 : i32
    return %c0_i32, %c0_i32_0, %c0_i32_1 : i32, i32, i32
  }
  func.func @transform_3(%arg0: i32) -> (i32, i32, i32) {
    %c0_i32 = arith.constant 0 : i32
    %c0_i32_0 = arith.constant 0 : i32
    %c0_i32_1 = arith.constant 0 : i32
    return %arg0, %c0_i32, %c0_i32_0 : i32, i32, i32
  }
}

module attributes {stable_mosaic.version = 11 : i64} {
  func.func @_conv_relu_pool_kernel(%arg0: i32, %arg1: memref<16x84xf32, #tpu.memory_space<vmem>>, %arg2: memref<84x800xf32, #tpu.memory_space<vmem>>, %arg3: memref<1x1x80xf32, #tpu.memory_space<vmem>>, %arg4: memref<1x5x80xf32, #tpu.memory_space<vmem>>) attributes {dimension_semantics = [#tpu.dimension_semantics<parallel>], iteration_bounds = array<i64: 2>, scalar_prefetch = 0 : i64, scratch_operands = 0 : i64, tpu.core_type = #tpu.core_type<tc>, window_params = [{transform_indices = @transform_0, window_bounds = array<i64: 16, 84>}, {pipeline_mode = #tpu.pipeline_mode<synchronous>, transform_indices = @transform_1, window_bounds = array<i64: 84, 800>}, {pipeline_mode = #tpu.pipeline_mode<synchronous>, transform_indices = @transform_2, window_bounds = array<i64: 1, 1, 80>}, {transform_indices = @transform_3, window_bounds = array<i64: 1, 5, 80>}]} {
    %c0 = arith.constant 0 : index
    %c0_0 = arith.constant 0 : index
    %0 = vector.load %arg1[%c0, %c0_0] : memref<16x84xf32, #tpu.memory_space<vmem>>, vector<16x84xf32>
    %c0_1 = arith.constant 0 : index
    %c0_2 = arith.constant 0 : index
    %1 = vector.load %arg2[%c0_1, %c0_2] : memref<84x800xf32, #tpu.memory_space<vmem>>, vector<84x800xf32>
    %cst = arith.constant dense<0.000000e+00> : vector<16x800xf32>
    %2 = tpu.matmul %0, %1, %cst {dimension_numbers = #tpu.dot_dimension_numbers<[1], [0], [0], [1], [0, 0, 1, 1], [], []>} : vector<16x84xf32>, vector<84x800xf32>, vector<16x800xf32> -> vector<16x800xf32>
    %3 = vector.shape_cast %2 : vector<16x800xf32> to vector<1x2x8x800xf32>
    %4 = vector.extract_strided_slice %3 {offsets = [0, 0, 0, 0], sizes = [1, 1, 5, 160], strides = [1, 1, 1, 1]} : vector<1x2x8x800xf32> to vector<1x1x5x160xf32>
    %5 = vector.shape_cast %4 : vector<1x1x5x160xf32> to vector<1x5x160xf32>
    %6 = vector.extract_strided_slice %3 {offsets = [0, 1, 0, 160], sizes = [1, 1, 5, 160], strides = [1, 1, 1, 1]} : vector<1x2x8x800xf32> to vector<1x1x5x160xf32>
    %7 = vector.shape_cast %6 : vector<1x1x5x160xf32> to vector<1x5x160xf32>
    %8 = arith.addf %5, %7 : vector<1x5x160xf32>
    %9 = vector.extract_strided_slice %3 {offsets = [0, 0, 1, 320], sizes = [1, 1, 5, 160], strides = [1, 1, 1, 1]} : vector<1x2x8x800xf32> to vector<1x1x5x160xf32>
    %10 = vector.shape_cast %9 : vector<1x1x5x160xf32> to vector<1x5x160xf32>
    %11 = arith.addf %8, %10 : vector<1x5x160xf32>
    %12 = vector.extract_strided_slice %3 {offsets = [0, 1, 1, 480], sizes = [1, 1, 5, 160], strides = [1, 1, 1, 1]} : vector<1x2x8x800xf32> to vector<1x1x5x160xf32>
    %13 = vector.shape_cast %12 : vector<1x1x5x160xf32> to vector<1x5x160xf32>
    %14 = arith.addf %11, %13 : vector<1x5x160xf32>
    %15 = vector.extract_strided_slice %3 {offsets = [0, 0, 2, 640], sizes = [1, 1, 5, 160], strides = [1, 1, 1, 1]} : vector<1x2x8x800xf32> to vector<1x1x5x160xf32>
    %16 = vector.shape_cast %15 : vector<1x1x5x160xf32> to vector<1x5x160xf32>
    %17 = arith.addf %14, %16 : vector<1x5x160xf32>
    %18 = vector.extract_strided_slice %3 {offsets = [0, 1, 0, 0], sizes = [1, 1, 5, 160], strides = [1, 1, 1, 1]} : vector<1x2x8x800xf32> to vector<1x1x5x160xf32>
    %19 = vector.shape_cast %18 : vector<1x1x5x160xf32> to vector<1x5x160xf32>
    %20 = vector.extract_strided_slice %3 {offsets = [0, 0, 1, 160], sizes = [1, 1, 5, 160], strides = [1, 1, 1, 1]} : vector<1x2x8x800xf32> to vector<1x1x5x160xf32>
    %21 = vector.shape_cast %20 : vector<1x1x5x160xf32> to vector<1x5x160xf32>
    %22 = arith.addf %19, %21 : vector<1x5x160xf32>
    %23 = vector.extract_strided_slice %3 {offsets = [0, 1, 1, 320], sizes = [1, 1, 5, 160], strides = [1, 1, 1, 1]} : vector<1x2x8x800xf32> to vector<1x1x5x160xf32>
    %24 = vector.shape_cast %23 : vector<1x1x5x160xf32> to vector<1x5x160xf32>
    %25 = arith.addf %22, %24 : vector<1x5x160xf32>
    %26 = vector.extract_strided_slice %3 {offsets = [0, 0, 2, 480], sizes = [1, 1, 5, 160], strides = [1, 1, 1, 1]} : vector<1x2x8x800xf32> to vector<1x1x5x160xf32>
    %27 = vector.shape_cast %26 : vector<1x1x5x160xf32> to vector<1x5x160xf32>
    %28 = arith.addf %25, %27 : vector<1x5x160xf32>
    %29 = vector.extract_strided_slice %3 {offsets = [0, 1, 2, 640], sizes = [1, 1, 5, 160], strides = [1, 1, 1, 1]} : vector<1x2x8x800xf32> to vector<1x1x5x160xf32>
    %30 = vector.shape_cast %29 : vector<1x1x5x160xf32> to vector<1x5x160xf32>
    %31 = arith.addf %28, %30 : vector<1x5x160xf32>
    %32 = arith.maximumf %17, %31 : vector<1x5x160xf32>
    %33 = vector.extract_strided_slice %32 {offsets = [0, 0, 0], sizes = [1, 5, 80], strides = [1, 1, 1]} : vector<1x5x160xf32> to vector<1x5x80xf32>
    %34 = vector.extract_strided_slice %32 {offsets = [0, 0, 80], sizes = [1, 5, 80], strides = [1, 1, 1]} : vector<1x5x160xf32> to vector<1x5x80xf32>
    %35 = arith.maximumf %33, %34 : vector<1x5x80xf32>
    %c0_3 = arith.constant 0 : index
    %c0_4 = arith.constant 0 : index
    %c0_5 = arith.constant 0 : index
    %36 = vector.load %arg3[%c0_3, %c0_4, %c0_5] : memref<1x1x80xf32, #tpu.memory_space<vmem>>, vector<1x1x80xf32>
    %37 = vector.broadcast %36 : vector<1x1x80xf32> to vector<1x5x80xf32>
    %38 = arith.addf %35, %37 : vector<1x5x80xf32>
    %cst_6 = arith.constant 0.000000e+00 : f32
    %39 = vector.broadcast %cst_6 : f32 to vector<1x5x80xf32>
    %40 = arith.maximumf %38, %39 : vector<1x5x80xf32>
    %c0_7 = arith.constant 0 : index
    %c0_8 = arith.constant 0 : index
    %c0_9 = arith.constant 0 : index
    %41 = vector.load %arg4[%c0_7, %c0_8, %c0_9] : memref<1x5x80xf32, #tpu.memory_space<vmem>>, vector<1x5x80xf32>
    tpu.vector_store %arg4[%c0_7, %c0_8, %c0_9], %40 {strides = array<i32>} : memref<1x5x80xf32, #tpu.memory_space<vmem>>, vector<1x5x80xf32>,
    return
  }
  func.func @transform_0(%arg0: i32) -> (i32, i32) {
    %c0_i32 = arith.constant 0 : i32
    %c0_i32_0 = arith.constant 0 : i32
    return %arg0, %c0_i32 : i32, i32
  }
  func.func @transform_1(%arg0: i32) -> (i32, i32) {
    %c0_i32 = arith.constant 0 : i32
    %c0_i32_0 = arith.constant 0 : i32
    %c0_i32_1 = arith.constant 0 : i32
    return %c0_i32, %c0_i32_0 : i32, i32
  }
  func.func @transform_2(%arg0: i32) -> (i32, i32, i32) {
    %c0_i32 = arith.constant 0 : i32
    %c0_i32_0 = arith.constant 0 : i32
    %c0_i32_1 = arith.constant 0 : i32
    %c0_i32_2 = arith.constant 0 : i32
    return %c0_i32, %c0_i32_0, %c0_i32_1 : i32, i32, i32
  }
  func.func @transform_3(%arg0: i32) -> (i32, i32, i32) {
    %c0_i32 = arith.constant 0 : i32
    %c0_i32_0 = arith.constant 0 : i32
    %c0_i32_1 = arith.constant 0 : i32
    return %arg0, %c0_i32, %c0_i32_0 : i32, i32, i32
  }
}

module attributes {stable_mosaic.version = 11 : i64} {
  func.func @_fc_stack_kernel(%arg0: i32, %arg1: memref<8x512xf32, #tpu.memory_space<vmem>>, %arg2: memref<512x128xf32, #tpu.memory_space<vmem>>, %arg3: memref<1x128xf32, #tpu.memory_space<vmem>>, %arg4: memref<128x128xf32, #tpu.memory_space<vmem>>, %arg5: memref<1x128xf32, #tpu.memory_space<vmem>>, %arg6: memref<128x128xf32, #tpu.memory_space<vmem>>, %arg7: memref<1x128xf32, #tpu.memory_space<vmem>>, %arg8: memref<8x128xf32, #tpu.memory_space<vmem>>) attributes {dimension_semantics = [#tpu.dimension_semantics<parallel>], iteration_bounds = array<i64: 1>, scalar_prefetch = 0 : i64, scratch_operands = 0 : i64, tpu.core_type = #tpu.core_type<tc>, window_params = [{transform_indices = @transform_0, window_bounds = array<i64: 8, 512>}, {pipeline_mode = #tpu.pipeline_mode<synchronous>, transform_indices = @transform_1, window_bounds = array<i64: 512, 128>}, {pipeline_mode = #tpu.pipeline_mode<synchronous>, transform_indices = @transform_2, window_bounds = array<i64: 1, 128>}, {pipeline_mode = #tpu.pipeline_mode<synchronous>, transform_indices = @transform_3, window_bounds = array<i64: 128, 128>}, {pipeline_mode = #tpu.pipeline_mode<synchronous>, transform_indices = @transform_4, window_bounds = array<i64: 1, 128>}, {pipeline_mode = #tpu.pipeline_mode<synchronous>, transform_indices = @transform_5, window_bounds = array<i64: 128, 128>}, {pipeline_mode = #tpu.pipeline_mode<synchronous>, transform_indices = @transform_6, window_bounds = array<i64: 1, 128>}, {transform_indices = @transform_7, window_bounds = array<i64: 8, 128>}]} {
    %c0 = arith.constant 0 : index
    %c0_0 = arith.constant 0 : index
    %0 = vector.load %arg1[%c0, %c0_0] : memref<8x512xf32, #tpu.memory_space<vmem>>, vector<8x512xf32>
    %c0_1 = arith.constant 0 : index
    %c0_2 = arith.constant 0 : index
    %1 = vector.load %arg2[%c0_1, %c0_2] : memref<512x128xf32, #tpu.memory_space<vmem>>, vector<512x128xf32>
    %cst = arith.constant dense<0.000000e+00> : vector<8x128xf32>
    %2 = tpu.matmul %0, %1, %cst {dimension_numbers = #tpu.dot_dimension_numbers<[1], [0], [0], [1], [0, 0, 1, 1], [], []>} : vector<8x512xf32>, vector<512x128xf32>, vector<8x128xf32> -> vector<8x128xf32>
    %c0_3 = arith.constant 0 : index
    %c0_4 = arith.constant 0 : index
    %3 = vector.load %arg3[%c0_3, %c0_4] : memref<1x128xf32, #tpu.memory_space<vmem>>, vector<1x128xf32>
    %4 = vector.broadcast %3 : vector<1x128xf32> to vector<8x128xf32>
    %5 = arith.addf %2, %4 : vector<8x128xf32>
    %cst_5 = arith.constant 0.000000e+00 : f32
    %6 = vector.broadcast %cst_5 : f32 to vector<8x128xf32>
    %7 = arith.maximumf %5, %6 : vector<8x128xf32>
    %c0_6 = arith.constant 0 : index
    %c0_7 = arith.constant 0 : index
    %8 = vector.load %arg4[%c0_6, %c0_7] : memref<128x128xf32, #tpu.memory_space<vmem>>, vector<128x128xf32>
    %cst_8 = arith.constant dense<0.000000e+00> : vector<8x128xf32>
    %9 = tpu.matmul %7, %8, %cst_8 {dimension_numbers = #tpu.dot_dimension_numbers<[1], [0], [0], [1], [0, 0, 1, 1], [], []>} : vector<8x128xf32>, vector<128x128xf32>, vector<8x128xf32> -> vector<8x128xf32>
    %c0_9 = arith.constant 0 : index
    %c0_10 = arith.constant 0 : index
    %10 = vector.load %arg5[%c0_9, %c0_10] : memref<1x128xf32, #tpu.memory_space<vmem>>, vector<1x128xf32>
    %11 = vector.broadcast %10 : vector<1x128xf32> to vector<8x128xf32>
    %12 = arith.addf %9, %11 : vector<8x128xf32>
    %cst_11 = arith.constant 0.000000e+00 : f32
    %13 = vector.broadcast %cst_11 : f32 to vector<8x128xf32>
    %14 = arith.maximumf %12, %13 : vector<8x128xf32>
    %c0_12 = arith.constant 0 : index
    %c0_13 = arith.constant 0 : index
    %15 = vector.load %arg6[%c0_12, %c0_13] : memref<128x128xf32, #tpu.memory_space<vmem>>, vector<128x128xf32>
    %cst_14 = arith.constant dense<0.000000e+00> : vector<8x128xf32>
    %16 = tpu.matmul %14, %15, %cst_14 {dimension_numbers = #tpu.dot_dimension_numbers<[1], [0], [0], [1], [0, 0, 1, 1], [], []>} : vector<8x128xf32>, vector<128x128xf32>, vector<8x128xf32> -> vector<8x128xf32>
    %c0_15 = arith.constant 0 : index
    %c0_16 = arith.constant 0 : index
    %17 = vector.load %arg7[%c0_15, %c0_16] : memref<1x128xf32, #tpu.memory_space<vmem>>, vector<1x128xf32>
    %18 = vector.broadcast %17 : vector<1x128xf32> to vector<8x128xf32>
    %19 = arith.addf %16, %18 : vector<8x128xf32>
    %c0_17 = arith.constant 0 : index
    %c0_18 = arith.constant 0 : index
    %20 = vector.load %arg8[%c0_17, %c0_18] : memref<8x128xf32, #tpu.memory_space<vmem>>, vector<8x128xf32>
    tpu.vector_store %arg8[%c0_17, %c0_18], %19 {strides = array<i32>} : memref<8x128xf32, #tpu.memory_space<vmem>>, vector<8x128xf32>,
    return
  }
  func.func @transform_0(%arg0: i32) -> (i32, i32) {
    %c0_i32 = arith.constant 0 : i32
    %c0_i32_0 = arith.constant 0 : i32
    return %arg0, %c0_i32 : i32, i32
  }
  func.func @transform_1(%arg0: i32) -> (i32, i32) {
    %c0_i32 = arith.constant 0 : i32
    %c0_i32_0 = arith.constant 0 : i32
    %c0_i32_1 = arith.constant 0 : i32
    return %c0_i32, %c0_i32_0 : i32, i32
  }
  func.func @transform_2(%arg0: i32) -> (i32, i32) {
    %c0_i32 = arith.constant 0 : i32
    %c0_i32_0 = arith.constant 0 : i32
    %c0_i32_1 = arith.constant 0 : i32
    return %c0_i32, %c0_i32_0 : i32, i32
  }
  func.func @transform_3(%arg0: i32) -> (i32, i32) {
    %c0_i32 = arith.constant 0 : i32
    %c0_i32_0 = arith.constant 0 : i32
    %c0_i32_1 = arith.constant 0 : i32
    return %c0_i32, %c0_i32_0 : i32, i32
  }
  func.func @transform_4(%arg0: i32) -> (i32, i32) {
    %c0_i32 = arith.constant 0 : i32
    %c0_i32_0 = arith.constant 0 : i32
    %c0_i32_1 = arith.constant 0 : i32
    return %c0_i32, %c0_i32_0 : i32, i32
  }
  func.func @transform_5(%arg0: i32) -> (i32, i32) {
    %c0_i32 = arith.constant 0 : i32
    %c0_i32_0 = arith.constant 0 : i32
    %c0_i32_1 = arith.constant 0 : i32
    return %c0_i32, %c0_i32_0 : i32, i32
  }
  func.func @transform_6(%arg0: i32) -> (i32, i32) {
    %c0_i32 = arith.constant 0 : i32
    %c0_i32_0 = arith.constant 0 : i32
    %c0_i32_1 = arith.constant 0 : i32
    return %c0_i32, %c0_i32_0 : i32, i32
  }
  func.func @transform_7(%arg0: i32) -> (i32, i32) {
    %c0_i32 = arith.constant 0 : i32
    %c0_i32_0 = arith.constant 0 : i32
    return %arg0, %c0_i32 : i32, i32
  }
}

</mosaic_0001>

<bundles_post_ra>
// kernel: convnet_forward.3
= control target key start
LH: loop header
LB: loop body
LE: loop exit
PB: predicated region body
PF: predicated region fallthrough
CT: control target
= control target key end

     0   :  { %s1066_s12 = smov 0   ;;  %s1514_s0 = inlined_call_operand.vmem [shape: f32[64,96], index: 0, kind: input, shape index: {}]   ;;  %s1515_s1 = inlined_call_operand.vmem [shape: f32[96,840], index: 1, kind: input, shape index: {}]   ;;  %s1516_s2 = inlined_call_operand.vmem [shape: f32[1,1,84], index: 2, kind: input, shape index: {}]   ;;  %s1517_s3 = inlined_call_operand.vmem [shape: f32[2,14,84], index: 3, kind: output, shape index: {}]  }
   0x1 LB: > { %s1072_s13 = sadd.s32 4294967295, %s1038_s12   ;;  %p947_p0 = scmp.ge.s32.totalorder %s1038_s12, 1  ;;  %s1038_s12 = sphi %s1066_s12, %s13_s12  }
   0x2   : > { %p138_p1 = scmp.lt.s32.totalorder %s1038_s12, 3 }
   0x4   : > { %p139_p2 = pnand %p947_p0, %p138_p1 }
   0x5   : > { %s948_s19 = sshll.u32 (!%p139_p2), %s1072_s13, 2  ;;  %s1041_s15 = smov (!%p139_p2), 48  }
   0x6   : > { %142 = sbr.rel (%p139_p2) target bundleno = 546 (0x222), region = 32  ;;  %p1143_p3 = scmp.lt.s32.totalorder (!%p139_p2), %s948_s19, 7 }
   0x7   : > { %s1043_s17 = smov (!%p139_p2), 8   ;;  %s1044_s18 = smov (!%p139_p2), 96  }
   0x8   : > { %s1045_s20 = smov (!%p139_p2), 44   ;;  %p168_p4 = scmp.lt.s32.totalorder (!%p139_p2), %s1072_s13, 1 }
   0xb   : > { %v257_v0 = vld [vmem:[%s1515_s1 + $0x280] sm:$0xff]  ;;  %v256_v1 = vld [vmem:[%s1515_s1 + $0x278] sm:$0xff]  ;;  %v250_v2 = vld [vmem:[%s1515_s1 + $0x248] sm:$0xff]  ;;  %v1040_v5 = vmov 0.0   ;;  %s1520_s19 = smov (!%p1143_p3, %s948_s19), 7  ;;  %vm261_vm0 = vcmask 785408  }
   0xc   : > { %371 = vmatprep.subr.mxu1 %v257_v0  ;;  %v249_v3 = vld [vmem:[%s1515_s1 + $0x240] sm:$0xff]  ;;  %v255_v4 = vld [vmem:[%s1515_s1 + $0x270] sm:$0xff]  ;;  %427 = vmatprep.mubr.f32.mxu1 %v1040_v5  ;;  %v254_v7 = vld [vmem:[%s1515_s1 + $0x268] sm:$0xff]  ;;  %s949_s16 = sshll.u32 %s1520_s19, 3  ;;  %vm653_vm1 = vcmask 1046528   ;;  %vm723_vm2 = vcmask 1045504  }
   0xd   : > { %372 = vmatpush1.msra.mxu1 %v256_v1  ;;  %282 = vmatprep.subr.mxu0 %v255_v4  ;;  %v243_v6 = vld [vmem:[%s1515_s1 + $0x210] sm:$0xff]  ;;  %v248_v8 = vld [vmem:[%s1515_s1 + $0x238] sm:$0xff]  ;;  %v242_v9 = vld [vmem:[%s1515_s1 + $0x208] sm:$0xff]  ;;  %s1223_s4 = scalar_lea.vmem %s1514_s0, %s949_s16  ;;  %s1042_s16 = smov 88   ;;  %vm638_vm3 = vcmask 719872   ;;  %vm668_vm4 = vcmask 392192  }
   0xe   : > { %373 = vmatprep.subr.mxu1 %v250_v2  ;;  %283 = vmatpush1.msra.mxu0 %v254_v7  ;;  %v247_v10 = vld [vmem:[%s1515_s1 + $0x230] sm:$0xff]  ;;  %v236_v11 = vld [vmem:[%s1515_s1 + $0x1d8] sm:$0xff]  ;;  %v241_v12 = vld [vmem:[%s1515_s1 + $0x200] sm:$0xff]  ;;  %vm706_vm5 = vcmask 64512   ;;  %s1522_s13 = smov (!%p168_p4, %s1072_s13), 1  ;;  %vm866_vm6 = vcmask 359424  }
   0xf   : > { %374 = vmatpush1.msra.mxu1 %v249_v3  ;;  %284 = vmatprep.subr.mxu0 %v248_v8  ;;  %v240_v13 = vld [vmem:[%s1515_s1 + $0x1f8] sm:$0xff]  ;;  %v235_v14 = vld [vmem:[%s1515_s1 + $0x1d0] sm:$0xff]  ;;  %v234_v15 = vld [vmem:[%s1515_s1 + $0x1c8] sm:$0xff]  ;;  %vm884_vm7 = vcmask 687104   ;;  %vm886_vm8 = vcmask 685056  }
  0x10   : > { %375 = vmatprep.subr.mxu1 %v243_v6  ;;  %285 = vmatpush1.msra.mxu0 %v247_v10  ;;  %v229_v16 = vld [vmem:[%s1515_s1 + $0x1a0] sm:$0xff]  ;;  %v228_v18 = vld [vmem:[%s1515_s1 + $0x198] sm:$0xff]  ;;  %v227_v19 = vld [vmem:[%s1515_s1 + $0x190] sm:$0xff] }
  0x11   : > { %376 = vmatpush1.msra.mxu1 %v242_v9  ;;  %286 = vmatprep.subr.mxu0 %v241_v12  ;;  %v233_v17 = vld [vmem:[%s1515_s1 + $0x1c0] sm:$0xff]  ;;  %v222_v20 = vld [vmem:[%s1515_s1 + $0x168] sm:$0xff]  ;;  %v220_v23 = vld [vmem:[%s1515_s1 + $0x158] sm:$0xff] }
  0x12   : > { %377 = vmatprep.subr.mxu1 %v236_v11  ;;  %287 = vmatpush1.msra.mxu0 %v240_v13  ;;  %v226_v21 = vld [vmem:[%s1515_s1 + $0x188] sm:$0xff]  ;;  %v221_v22 = vld [vmem:[%s1515_s1 + $0x160] sm:$0xff]  ;;  %v215_v24 = vld [vmem:[%s1515_s1 + $0x130] sm:$0xff] }
  0x13   : > { %378 = vmatpush1.msra.mxu1 %v235_v14  ;;  %288 = vmatprep.subr.mxu0 %v234_v15  ;;  %v219_v25 = vld [vmem:[%s1515_s1 + $0x150] sm:$0xff]  ;;  %v214_v26 = vld [vmem:[%s1515_s1 + $0x128] sm:$0xff]  ;;  %v213_v27 = vld [vmem:[%s1515_s1 + $0x120] sm:$0xff] }
  0x14   : > { %379 = vmatprep.subr.mxu1 %v229_v16  ;;  %289 = vmatpush1.msra.mxu0 %v233_v17  ;;  %v208_v28 = vld [vmem:[%s1515_s1 + $0xf8] sm:$0xff]  ;;  %v207_v30 = vld [vmem:[%s1515_s1 + $0xf0] sm:$0xff]  ;;  %v206_v31 = vld [vmem:[%s1515_s1 + $0xe8] sm:$0xff] }
  0x15   : > { %380 = vmatpush1.msra.mxu1 %v228_v18  ;;  %290 = vmatprep.subr.mxu0 %v227_v19  ;;  %v212_v29 = vld [vmem:[%s1515_s1 + $0x118] sm:$0xff]  ;;  %v201_v32 = vld [vmem:[%s1515_s1 + $0xc0] sm:$0xff]  ;;  %v199_v35 = vld [vmem:[%s1515_s1 + $0xb0] sm:$0xff] }
  0x16   : > { %381 = vmatprep.subr.mxu1 %v222_v20  ;;  %291 = vmatpush1.msra.mxu0 %v226_v21  ;;  %v205_v33 = vld [vmem:[%s1515_s1 + $0xe0] sm:$0xff]  ;;  %v200_v34 = vld [vmem:[%s1515_s1 + $0xb8] sm:$0xff]  ;;  %v194_v36 = vld [vmem:[%s1515_s1 + $0x88] sm:$0xff] }
  0x17   : > { %382 = vmatpush1.msra.mxu1 %v221_v22  ;;  %292 = vmatprep.subr.mxu0 %v220_v23  ;;  %v198_v37 = vld [vmem:[%s1515_s1 + $0xa8] sm:$0xff]  ;;  %v193_v38 = vld [vmem:[%s1515_s1 + $0x80] sm:$0xff]  ;;  %v192_v39 = vld [vmem:[%s1515_s1 + $0x78] sm:$0xff] }
  0x18   : > { %383 = vmatprep.subr.mxu1 %v215_v24  ;;  %293 = vmatpush1.msra.mxu0 %v219_v25  ;;  %v187_v40 = vld [vmem:[%s1515_s1 + $0x50] sm:$0xff]  ;;  %v186_v42 = vld [vmem:[%s1515_s1 + $0x48] sm:$0xff]  ;;  %v185_v43 = vld [vmem:[%s1515_s1 + $0x40] sm:$0xff] }
  0x19   : > { %384 = vmatpush1.msra.mxu1 %v214_v26  ;;  %294 = vmatprep.subr.mxu0 %v213_v27  ;;  %v191_v41 = vld [vmem:[%s1515_s1 + $0x70] sm:$0xff]  ;;  %v180_v44 = vld [vmem:[%s1515_s1 + $0x18] sm:$0xff]  ;;  %v178_v47 = vld [vmem:[%s1515_s1 + $0x8] sm:$0xff] }
  0x1a   : > { %385 = vmatprep.subr.mxu1 %v208_v28  ;;  %295 = vmatpush1.msra.mxu0 %v212_v29  ;;  %v184_v45 = vld [vmem:[%s1515_s1 + $0x38] sm:$0xff]  ;;  %v179_v46 = vld [vmem:[%s1515_s1 + $0x10] sm:$0xff]  ;;  %v1238_v48 = vld [vmem:[%s1223_s4] sm:$0xff] }
  0x1b   : > { %386 = vmatpush1.msra.mxu1 %v207_v30  ;;  %296 = vmatprep.subr.mxu0 %v206_v31  ;;  %v177_v49 = vld [vmem:[%s1515_s1] sm:$0xff]  ;;  %v259_v50 = vld [vmem:[%s1515_s1 + $0x290] sm:$0xff]  ;;  %v258_v51 = vld [vmem:[%s1515_s1 + $0x288] sm:$0xff] }
  0x1c   : > { %387 = vmatprep.subr.mxu1 %v201_v32  ;;  %297 = vmatpush1.msra.mxu0 %v205_v33  ;;  %v1254_v52 = vld [vmem:[%s1223_s4 + $0x8] sm:$0xff]  ;;  %v252_v53 = vld [vmem:[%s1515_s1 + $0x258] sm:$0xff]  ;;  %v251_v54 = vld [vmem:[%s1515_s1 + $0x250] sm:$0xff] }
  0x1d   : > { %388 = vmatpush1.msra.mxu1 %v200_v34  ;;  %298 = vmatprep.subr.mxu0 %v199_v35  ;;  %v245_v55 = vld [vmem:[%s1515_s1 + $0x220] sm:$0xff]  ;;  %v244_v56 = vld [vmem:[%s1515_s1 + $0x218] sm:$0xff]  ;;  %v1278_v58 = vld [vmem:[%s1223_s4 + $0x10] sm:$0xff] }
  0x1e   : > { %389 = vmatprep.subr.mxu1 %v194_v36  ;;  %299 = vmatpush1.msra.mxu0 %v198_v37  ;;  %v260_v57 = vld [vmem:[%s1515_s1 + $0x298] sm:$0xff]  ;;  %v238_v59 = vld [vmem:[%s1515_s1 + $0x1e8] sm:$0xff]  ;;  %v237_v60 = vld [vmem:[%s1515_s1 + $0x1e0] sm:$0xff] }
  0x1f   : > { %390 = vmatpush1.msra.mxu1 %v193_v38  ;;  %300 = vmatprep.subr.mxu0 %v192_v39  ;;  %v231_v61 = vld [vmem:[%s1515_s1 + $0x1b0] sm:$0xff]  ;;  %v230_v62 = vld [vmem:[%s1515_s1 + $0x1a8] sm:$0xff]  ;;  %v253_v63 = vld [vmem:[%s1515_s1 + $0x260] sm:$0xff] }
  0x20   : > { %391 = vmatprep.subr.mxu1 %v187_v40  ;;  %301 = vmatpush1.msra.mxu0 %v191_v41  ;;  %v1301_v0 = vld [vmem:[%s1223_s4 + $0x18] sm:$0xff]  ;;  %v223_v2 = vld [vmem:[%s1515_s1 + $0x170] sm:$0xff]  ;;  %v217_v3 = vld [vmem:[%s1515_s1 + $0x140] sm:$0xff]  ;;  %s971_s4 = sshll.u32 %s1522_s13, 4 }
  0x21   : > { %392 = vmatpush1.msra.mxu1 %v186_v42  ;;  %302 = vmatprep.subr.mxu0 %v185_v43  ;;  %v224_v1 = vld [vmem:[%s1515_s1 + $0x178] sm:$0xff]  ;;  %v246_v4 = vld [vmem:[%s1515_s1 + $0x228] sm:$0xff]  ;;  %v239_v8 = vld [vmem:[%s1515_s1 + $0x1f0] sm:$0xff]  ;;  %s172_s25 = scalar_lea.vmem %s1517_s3, %s971_s4 }
  0x22   : > { %393 = vmatprep.subr.mxu1 %v180_v44  ;;  %303 = vmatpush1.msra.mxu0 %v184_v45  ;;  %v216_v6 = vld [vmem:[%s1515_s1 + $0x138] sm:$0xff]  ;;  %v210_v7 = vld [vmem:[%s1515_s1 + $0x108] sm:$0xff]  ;;  %v209_v9 = vld [vmem:[%s1515_s1 + $0x100] sm:$0xff] }
  0x23   : > { %394 = vmatpush1.msra.mxu1 %v179_v46  ;;  %304 = vmatprep.subr.mxu0 %v178_v47  ;;  %v203_v10 = vld [vmem:[%s1515_s1 + $0xd0] sm:$0xff]  ;;  %v232_v11 = vld [vmem:[%s1515_s1 + $0x1b8] sm:$0xff]  ;;  %v202_v12 = vld [vmem:[%s1515_s1 + $0xc8] sm:$0xff] }
  0x24   : > { %956 = vmatmul.mubr.msk.f32.vlgmr.msra.gmra.mxu1 %vm261_vm0, %v1238_v48  ;;  %305 = vmatpush1.msra.mxu0 %v177_v49  ;;  %v196_v13 = vld [vmem:[%s1515_s1 + $0x98] sm:$0xff]  ;;  %v225_v14 = vld [vmem:[%s1515_s1 + $0x180] sm:$0xff]  ;;  %v195_v15 = vld [vmem:[%s1515_s1 + $0x90] sm:$0xff] }
  0x25   : > { %338 = vmatprep.mubr.f32.mxu0 %v1040_v5  ;;  %433 = vmatprep.mubr.f32.mxu1 %v1040_v5  ;;  %v189_v16 = vld [vmem:[%s1515_s1 + $0x60] sm:$0xff]  ;;  %v218_v17 = vld [vmem:[%s1515_s1 + $0x148] sm:$0xff]  ;;  %v188_v18 = vld [vmem:[%s1515_s1 + $0x58] sm:$0xff] }
  0x26   : > { %952 = vmatmul.mubr.msk.f32.vlgmr.msra.gmra.mxu0 %vm261_vm0, %v1238_v48  ;;  %460 = vmatprep.subr.mxu0 %v259_v50  ;;  %v182_v19 = vld [vmem:[%s1515_s1 + $0x28] sm:$0xff]  ;;  %v211_v20 = vld [vmem:[%s1515_s1 + $0x110] sm:$0xff]  ;;  %v181_v21 = vld [vmem:[%s1515_s1 + $0x20] sm:$0xff] }
  0x27   : > { %344 = vmatprep.mubr.f32.mxu0 %v1040_v5  ;;  %461 = vmatpush1.msra.mxu0 %v258_v51  ;;  %v204_v22 = vld [vmem:[%s1515_s1 + $0xd8] sm:$0xff]  ;;  %v197_v23 = vld [vmem:[%s1515_s1 + $0xa0] sm:$0xff]  ;;  %v190_v24 = vld [vmem:[%s1515_s1 + $0x68] sm:$0xff] }
  0x28   : > { %957 = vmatmul.mubr.msk.f32.gmra.mxu1 %vm261_vm0, %v1254_v52  ;;  %462 = vmatprep.subr.mxu0 %v252_v53  ;;  %v183_v25 = vld [vmem:[%s1515_s1 + $0x30] sm:$0xff] }
  0x29   : > { %439 = vmatprep.mubr.f32.mxu1 %v1040_v5  ;;  %463 = vmatpush1.msra.mxu0 %v251_v54 }
  0x2a   : > { %953 = vmatmul.mubr.msk.f32.gmra.mxu0 %vm261_vm0, %v1254_v52  ;;  %464 = vmatprep.subr.mxu0 %v245_v55 }
  0x2b   : > { %465 = vmatpush1.msra.mxu0 %v244_v56  ;;  %988 = vmatprep.subr.mxu1 %v260_v57 }
  0x2c   : > { %958 = vmatmul.mubr.msk.f32.gmra.mxu1 %vm261_vm0, %v1278_v58  ;;  %466 = vmatprep.subr.mxu0 %v238_v59 }
  0x2d   : > { %445 = vmatprep.mubr.f32.mxu1 %v1040_v5  ;;  %467 = vmatpush1.msra.mxu0 %v237_v60 }
  0x2e   : > { %468 = vmatprep.subr.mxu0 %v231_v61  ;;  %989 = vmatpush3.msra.mxu1 %v260_v57 }
  0x2f   : > { %469 = vmatpush1.msra.mxu0 %v230_v62  ;;  %990 = vmatprep.subr.mxu1 %v253_v63 }
  0x30   : > { %959 = vmatmul.mubr.msk.f32.gmra.mxu1 %vm261_vm0, %v1301_v0  ;;  %470 = vmatprep.subr.mxu0 %v224_v1 }
  0x31   : > { %350 = vmatprep.mubr.f32.mxu0 %v1040_v5  ;;  %471 = vmatpush1.msra.mxu0 %v223_v2 }
  0x32   : > { %991 = vmatpush3.msra.mxu1 %v253_v63  ;;  %954 = vmatmul.mubr.msk.f32.gmra.mxu0 %vm261_vm0, %v1278_v58 }
  0x33   : > { %472 = vmatprep.subr.mxu0 %v217_v3  ;;  %992 = vmatprep.subr.mxu1 %v246_v4 }
  0x34   : > { %473 = vmatpush1.msra.mxu0 %v216_v6  ;;  %993 = vmatpush3.msra.mxu1 %v246_v4 }
  0x35   : > { %474 = vmatprep.subr.mxu0 %v210_v7  ;;  %994 = vmatprep.subr.mxu1 %v239_v8 }
  0x36   : > { %356 = vmatprep.mubr.f32.mxu0 %v1040_v5  ;;  %475 = vmatpush1.msra.mxu0 %v209_v9 }
  0x37   : > { %995 = vmatpush3.msra.mxu1 %v239_v8  ;;  %955 = vmatmul.mubr.msk.f32.gmra.mxu0 %vm261_vm0, %v1301_v0 }
  0x38   : > { %476 = vmatprep.subr.mxu0 %v203_v10  ;;  %996 = vmatprep.subr.mxu1 %v232_v11 }
  0x39   : > { %477 = vmatpush1.msra.mxu0 %v202_v12  ;;  %997 = vmatpush3.msra.mxu1 %v232_v11 }
  0x3a   : > { %478 = vmatprep.subr.mxu0 %v196_v13  ;;  %998 = vmatprep.subr.mxu1 %v225_v14 }
  0x3b   : > { %479 = vmatpush1.msra.mxu0 %v195_v15  ;;  %999 = vmatpush3.msra.mxu1 %v225_v14 }
  0x3c   : > { %480 = vmatprep.subr.mxu0 %v189_v16  ;;  %1000 = vmatprep.subr.mxu1 %v218_v17 }
  0x3d   : > { %481 = vmatpush1.msra.mxu0 %v188_v18  ;;  %1001 = vmatpush3.msra.mxu1 %v218_v17 }
  0x3e   : > { %482 = vmatprep.subr.mxu0 %v182_v19  ;;  %1002 = vmatprep.subr.mxu1 %v211_v20 }
  0x3f   : > { %483 = vmatpush1.msra.mxu0 %v181_v21  ;;  %516 = vmatprep.mubr.f32.mxu0 %v1040_v5 }
  0x40   : > { %1003 = vmatpush3.msra.mxu1 %v211_v20  ;;  %960 = vmatmul.mubr.msk.f32.vlgmr.msra.gmra.mxu0 %vm261_vm0, %v1238_v48 }
  0x41   : > { %1004 = vmatprep.subr.mxu1 %v204_v22  ;;  %522 = vmatprep.mubr.f32.mxu0 %v1040_v5 }
  0x42   : > { %1005 = vmatpush3.msra.mxu1 %v204_v22  ;;  %1012 = vmatprep.mubr.msk.f32.mxu1 %vm261_vm0, %v1238_v48 }
  0x43   : > { %1006 = vmatprep.subr.mxu1 %v197_v23 }
  0x44   : > { %1007 = vmatpush3.msra.mxu1 %v197_v23  ;;  %961 = vmatmul.mubr.msk.f32.gmra.mxu0 %vm261_vm0, %v1254_v52 }
  0x45   : > { %1008 = vmatprep.subr.mxu1 %v190_v24  ;;  %528 = vmatprep.mubr.f32.mxu0 %v1040_v5 }
  0x46   : > { %1009 = vmatpush3.msra.mxu1 %v190_v24 }
  0x47   : > { %1010 = vmatprep.subr.mxu1 %v183_v25 }
  0x48   : > { %1011 = vmatpush3.msra.mxu1 %v183_v25  ;;  %962 = vmatmul.mubr.msk.f32.gmra.mxu0 %vm261_vm0, %v1278_v58 }
  0x49   : > { %1013 = vmatmul.mubr.msk.f32.vlgmr.msra.gmra.mxu1 %vm261_vm0, %v1254_v52  ;;  %534 = vmatprep.mubr.f32.mxu0 %v1040_v5 }
  0x4a   : > { %1015 = vmatprep.mubr.msk.f32.mxu1 %vm261_vm0, %v1278_v58 }
  0x4c   : > { %963 = vmatmul.mubr.msk.f32.gmra.mxu0 %vm261_vm0, %v1301_v0 }
  0x4d   : > { %1016 = vmatmul.mubr.msk.f32.gmra.mxu1 %vm261_vm0, %v1301_v0 }
  0xe4   : > { %v429_v26 = vpop.f32.mrf.mxu1 }
  0xe5   : > { %v654_v5 = vrot.slane %v429_v26, 1 }
  0xe6   : > { %v431_v27 = vpop.f32.mrf.mxu1  ;;  %v1403_v28 = vpop.f32.mrf.mxu0 }
  0xe7   : > { %v657_v42 = vrot.slane %v431_v27, 1  ;;  %v794_v47 = vrot.slane %v431_v27, 2 }
  0xe8   : > { %v435_v29 = vpop.f32.mrf.mxu1  ;;  %v1405_v31 = vpop.f32.mrf.mxu0 }
  0xe9   : > { %v655_v30 = vrot.slane %v435_v29, 1  ;;  %v750_v40 = vrot.slane %v1405_v31, 1 }
  0xea   : > { %v437_v32 = vpop.f32.mrf.mxu1  ;;  %v1409_v33 = vpop.f32.mrf.mxu0 }
  0xeb   : > { %664 = vrot.lane.b32.xlu0 %v655_v30, %s1041_s15  ;;  %759 = vrot.lane.b32.xlu1 %v655_v30, %s1042_s16  ;;  %v656_v34 = vsel %vm653_vm1, %v654_v5, %v655_v30  ;;  %v658_v35 = vrot.slane %v437_v32, 1  ;;  %v795_v38 = vrot.slane %v437_v32, 2 }
  0xec   : > { %v441_v36 = vpop.f32.mrf.mxu1  ;;  %v1414_v37 = vpop.f32.mrf.mxu0 }
  0xed   : > { %v751_v39 = vrot.slane %v1414_v37, 1  ;;  %v659_v44 = vsel %vm653_vm1, %v657_v42, %v658_v35  ;;  %v796_v50 = vsel %vm723_vm2, %v794_v47, %v795_v38  ;;  %v771_v56 = vrot.slane %v441_v36, 1 }
  0xee   : > { %v443_v43 = vpop.f32.mrf.mxu1 }
  0xef   : > { %660 = vrot.lane.b32.xlu0 %v656_v34, %s1041_s15  ;;  %755 = vrot.lane.b32.xlu1 %v656_v34, %s1042_s16  ;;  %v752_v45 = vsel %vm653_vm1, %v750_v40, %v751_v39  ;;  %v685_v58 = vrot.slane %v443_v43, 1 }
  0xf0   : > { %v447_v48 = vpop.f32.mrf.mxu1 }
  0xf1   : > { %v772_v53 = vrot.slane %v447_v48, 1 }
  0xf2   : > { %v1420_v41 = vpop.f32.mrf.mxu0  ;;  %v449_v51 = vpop.f32.mrf.mxu1 }
  0xf3   : > { %666 = vrot.lane.b32.xlu1 %v658_v35, %s1041_s15  ;;  %632 = vrot.lane.b32.xlu0 %v441_v36, %s1042_s16  ;;  %v686_v54 = vrot.slane %v449_v51, 1  ;;  %v773_v59 = vsel %vm653_vm1, %v771_v56, %v772_v53 }
  0xf4   : > { %v1426_v46 = vpop.f32.mrf.mxu0 }
  0xf5   : > { %v687_v62 = vsel %vm653_vm1, %v685_v58, %v686_v54 }
  0xf7   : > { %806 = vrot.lane.b32.xlu1 %v795_v38, %s1043_s17  ;;  %757 = vrot.lane.b32.xlu0 %v751_v39, %s1042_s16  ;;  %v1430_v49 = vpop.f32.mrf.mxu0 }
  0xf9   : > { %v1435_v52 = vpop.f32.mrf.mxu0 }
  0xfb   : > { %662 = vrot.lane.b32.xlu1 %v659_v44, %s1041_s15  ;;  %753 = vrot.lane.b32.xlu0 %v752_v45, %s1042_s16 }
  0xff   : > { %636 = vrot.lane.b32.xlu1 %v447_v48, %s1042_s16  ;;  %800 = vrot.lane.b32.xlu0 %v796_v50, %s1043_s17 }
 0x100   : > { %v518_v55 = vpop.f32.mrf.mxu0 }
 0x101   : > { %v797_v7 = vrot.slane %v518_v55, 2 }
 0x102   : > { %v520_v57 = vpop.f32.mrf.mxu0 }
 0x103   : > { %630 = vrot.lane.b32.xlu0 %v1426_v46, %s1042_s16  ;;  %634 = vrot.lane.b32.xlu1 %v1435_v52, %s1042_s16  ;;  %v724_v8 = vrot.slane %v520_v57, 2 }
 0x104   : > { %v524_v61 = vpop.f32.mrf.mxu0 }
 0x105   : > { %v798_v1 = vrot.slane %v524_v61, 2 }
 0x106   : > { %v526_v2 = vpop.f32.mrf.mxu0 }
 0x107   : > { %778 = vrot.lane.b32.xlu0 %v772_v53, %s1041_s15  ;;  %780 = vrot.lane.b32.xlu1 %v686_v54, %s1041_s15  ;;  %v725_v6 = vrot.slane %v526_v2, 2  ;;  %v799_v12 = vsel %vm723_vm2, %v797_v7, %v798_v1 }
 0x108   : > { %v530_v4 = vpop.f32.mrf.mxu0 }
 0x109   : > { %v1014_v60 = vpop.f32.mrf.mxu1  ;;  %v726_v13 = vsel %vm723_vm2, %v724_v8, %v725_v6  ;;  %v688_v20 = vrot.slane %v530_v4, 1 }
 0x10a   : > { %v728_v63 = vrot.slane %v1014_v60, 2  ;;  %v532_v10 = vpop.f32.mrf.mxu0 }
 0x10b   : > { %774 = vrot.lane.b32.xlu0 %v773_v59, %s1041_s15  ;;  %700 = vrot.lane.b32.xlu1 %v686_v54, %s1043_s17  ;;  %v607_v0 = vpop.f32.mrf.mxu1  ;;  %v691_v21 = vrot.slane %v532_v10, 1  ;;  %v826_v24 = vrot.slane %v532_v10, 2 }
 0x10c   : > { %v727_v3 = vrot.slane %v607_v0, 2  ;;  %v536_v14 = vpop.f32.mrf.mxu0 }
 0x10d   : > { %v1017_v11 = vpop.f32.mrf.mxu1  ;;  %v689_v19 = vrot.slane %v536_v14, 1 }
 0x10e   : > { %v729_v9 = vsel %vm723_vm2, %v727_v3, %v728_v63  ;;  %v830_v16 = vrot.slane %v1017_v11, 2  ;;  %v538_v18 = vpop.f32.mrf.mxu0 }
 0x10f   : > { %694 = vrot.lane.b32.xlu0 %v687_v62, %s1043_s17  ;;  %776 = vrot.lane.b32.xlu1 %v687_v62, %s1041_s15  ;;  %v617_v15 = vpop.f32.mrf.mxu1  ;;  %v692_v22 = vrot.slane %v538_v18, 1  ;;  %v827_v25 = vrot.slane %v538_v18, 2  ;;  %v690_v26 = vsel %vm653_vm1, %v688_v20, %v689_v19 }
 0x110   : > { %v829_v17 = vrot.slane %v617_v15, 2 }
 0x111   : > { %v693_v27 = vsel %vm653_vm1, %v691_v21, %v692_v22  ;;  %v828_v29 = vsel %vm723_vm2, %v826_v24, %v827_v25 }
 0x112   : > { %v831_v23 = vsel %vm723_vm2, %v829_v17, %v830_v16 }
 0x113   : > { %736 = vrot.lane.b32.xlu1 %v728_v63, %s1044_s18  ;;  %808 = vrot.lane.b32.xlu0 %v798_v1, %s1043_s17 }
 0x117   : > { %732 = vrot.lane.b32.xlu1 %v729_v9, %s1044_s18  ;;  %734 = vrot.lane.b32.xlu0 %v725_v6, %s1044_s18 }
 0x11b   : > { %802 = vrot.lane.b32.xlu1 %v799_v12, %s1043_s17  ;;  %804 = vrot.lane.b32.xlu0 %v726_v13, %s1043_s17 }
 0x11f   : > { %810 = vrot.lane.b32.xlu1 %v725_v6, %s1043_s17  ;;  %730 = vrot.lane.b32.xlu0 %v726_v13, %s1044_s18 }
 0x123   : > { %834 = vrot.lane.b32.xlu1 %v831_v23, %s1044_s18  ;;  %702 = vrot.lane.b32.xlu0 %v689_v19, %s1043_s17 }
 0x127   : > { %696 = vrot.lane.b32.xlu1 %v690_v26, %s1043_s17  ;;  %698 = vrot.lane.b32.xlu0 %v693_v27, %s1043_s17 }
 0x12b   : > { %704 = vrot.lane.b32.xlu1 %v692_v22, %s1043_s17  ;;  %832 = vrot.lane.b32.xlu0 %v828_v29, %s1044_s18 }
 0x12f   : > { %838 = vrot.lane.b32.xlu1 %v830_v16, %s1044_s18  ;;  %836 = vrot.lane.b32.xlu0 %v827_v25, %s1044_s18 }
 0x15d   : > { %v665_v30 = vpop.permute.xlu0 %664  ;;  %v760_v5 = vpop.permute.xlu1 %759 }
 0x15e   : > { %v770_v9 = vadd.f32 %v760_v5, %v1435_v52 }
 0x161   : > { %v661_v32 = vpop.permute.xlu0 %660  ;;  %v756_v34 = vpop.permute.xlu1 %755 }
 0x162   : > { %v768_v10 = vadd.f32 %v756_v34, %v1426_v46 }
 0x165   : > { %v667_v35 = vpop.permute.xlu1 %666  ;;  %v633_v36 = vpop.permute.xlu0 %632 }
 0x166   : > { %v646_v11 = vadd.f32 %v633_v36, %v1405_v31  ;;  %v670_v12 = vsel %vm668_vm4, %v665_v30, %v667_v35 }
 0x169   : > { %v807_v38 = vpop.permute.xlu1 %806  ;;  %v758_v39 = vpop.permute.xlu0 %757 }
 0x16a   : > { %v762_v1 = vsel %vm638_vm3, %v758_v39, %v760_v5 }
 0x16b   : > { %v769_v13 = vadd.f32 %v762_v1, %v1430_v49 }
 0x16d   : > { %v663_v40 = vpop.permute.xlu1 %662  ;;  %v754_v42 = vpop.permute.xlu0 %753 }
 0x16e   : > { %v761_v2 = vsel %vm638_vm3, %v754_v42, %v756_v34  ;;  %v669_v14 = vsel %vm668_vm4, %v661_v32, %v663_v40  ;;  %v676_v15 = vadd.f32 %v663_v40, %v646_v11 }
 0x171   : > { %v637_v43 = vpop.permute.xlu1 %636  ;;  %v801_v44 = vpop.permute.xlu0 %800 }
 0x172   : > { %v648_v3 = vadd.f32 %v637_v43, %v1414_v37 }
 0x174   : > { %v678_v17 = vadd.f32 %v667_v35, %v648_v3 }
 0x175   : > { %v631_v45 = vpop.permute.xlu0 %630  ;;  %v635_v47 = vpop.permute.xlu1 %634 }
 0x176   : > { %v639_v0 = vsel %vm638_vm3, %v631_v45, %v633_v36  ;;  %v640_v6 = vsel %vm638_vm3, %v635_v47, %v637_v43 }
 0x177   : > { %v645_v4 = vadd.f32 %v639_v0, %v1403_v28  ;;  %v767_v28 = vadd.f32 %v761_v2, %v1420_v41  ;;  %v647_v16 = vadd.f32 %v640_v6, %v1409_v33 }
 0x179   : > { %v779_v48 = vpop.permute.xlu0 %778  ;;  %v781_v50 = vpop.permute.xlu1 %780  ;;  %v675_v18 = vadd.f32 %v669_v14, %v645_v4  ;;  %v677_v30 = vadd.f32 %v670_v12, %v647_v16  ;;  %v968_v4 = vld [vmem:[%s1516_s2] ss:$0 sm:$0xff] }
 0x17a   : > { %v783_v46 = vsel %vm668_vm4, %v779_v48, %v781_v50  ;;  %v791_v27 = vadd.f32 %v781_v50, %v770_v9 }
 0x17b   : > { %v790_v26 = vadd.f32 %v783_v46, %v769_v13 }
 0x17d   : > { %v775_v51 = vpop.permute.xlu0 %774  ;;  %v701_v53 = vpop.permute.xlu1 %700 }
 0x181   : > { %v695_v54 = vpop.permute.xlu0 %694  ;;  %v777_v55 = vpop.permute.xlu1 %776 }
 0x182   : > { %v782_v37 = vsel %vm668_vm4, %v775_v51, %v777_v55  ;;  %v789_v31 = vadd.f32 %v777_v55, %v768_v10 }
 0x183   : > { %v788_v21 = vadd.f32 %v782_v37, %v767_v28 }
 0x185   : > { %v1472_v56 = vpop.permute.xlu1 %736  ;;  %v809_v57 = vpop.permute.xlu0 %808 }
 0x186   : > { %v814_v29 = vsel %vm706_vm5, %v807_v38, %v809_v57 }
 0x187   : > { %v822_v51 = vadd.f32 %v814_v29, %v790_v26 }
 0x189   : > { %v733_v58 = vpop.permute.xlu1 %732  ;;  %v1474_v59 = vpop.permute.xlu0 %734 }
 0x18d   : > { %v803_v60 = vpop.permute.xlu1 %802  ;;  %v805_v61 = vpop.permute.xlu0 %804 }
 0x18e   : > { %v813_v52 = vsel %vm706_vm5, %v803_v60, %v805_v61  ;;  %v812_v49 = vsel %vm706_vm5, %v801_v44, %v803_v60 }
 0x18f   : > { %v821_v24 = vadd.f32 %v813_v52, %v789_v31  ;;  %v820_v5 = vadd.f32 %v812_v49, %v788_v21 }
 0x191   : > { %v811_v62 = vpop.permute.xlu1 %810  ;;  %v731_v63 = vpop.permute.xlu0 %730 }
 0x192   : > { %v815_v32 = vsel %vm706_vm5, %v809_v57, %v811_v62  ;;  %v738_v40 = vsel %vm261_vm0, %v731_v63, %v733_v58 }
 0x193   : > { %v823_v38 = vadd.f32 %v815_v32, %v791_v27 }
 0x195   : > { %v835_v7 = vpop.permute.xlu1 %834  ;;  %v703_v8 = vpop.permute.xlu0 %702 }
 0x196   : > { %v709_v41 = vsel %vm706_vm5, %v701_v53, %v703_v8  ;;  %v847_v34 = vadd.f32 %v835_v7, %v821_v24 }
 0x197   : > { %v717_v42 = vadd.f32 %v709_v41, %v677_v30 }
 0x199   : > { %v697_v19 = vpop.permute.xlu1 %696  ;;  %v699_v20 = vpop.permute.xlu0 %698 }
 0x19a   : > { %v707_v22 = vsel %vm706_vm5, %v695_v54, %v697_v19  ;;  %v708_v23 = vsel %vm706_vm5, %v697_v19, %v699_v20 }
 0x19b   : > { %v715_v33 = vadd.f32 %v707_v22, %v675_v18  ;;  %v716_v25 = vadd.f32 %v708_v23, %v676_v15 }
 0x19d   : > { %v745_v35 = vadd.f32 %v733_v58, %v716_v25  ;;  %v705_v36 = vpop.permute.xlu1 %704  ;;  %v833_v39 = vpop.permute.xlu0 %832  ;;  %v744_v45 = vadd.f32 %v738_v40, %v715_v33  ;;  %v739_v58 = vsel %vm261_vm0, %v1474_v59, %v1472_v56 }
 0x19e   : > { %v710_v43 = vsel %vm706_vm5, %v703_v8, %v705_v36  ;;  %v840_v44 = vsel %vm261_vm0, %v833_v39, %v835_v7  ;;  %v746_v62 = vadd.f32 %v739_v58, %v717_v42 }
 0x19f   : > { %v718_v47 = vadd.f32 %v710_v43, %v678_v17  ;;  %v846_v48 = vadd.f32 %v840_v44, %v820_v5  ;;  %v851_v50 = vmax.f32 %v745_v35, %v847_v34 }
 0x1a1   : > { %v747_v53 = vadd.f32 %v1472_v56, %v718_v47  ;;  %v839_v54 = vpop.permute.xlu1 %838  ;;  %860 = vrot.lane.b32.xlu1 %v851_v50, %s1045_s20  ;;  %v837_v55 = vpop.permute.xlu0 %836  ;;  %v850_v57 = vmax.f32 %v744_v45, %v846_v48 }
 0x1a2   : > { %v849_v60 = vadd.f32 %v839_v54, %v823_v38  ;;  %v841_v61 = vsel %vm261_vm0, %v837_v55, %v839_v54 }
 0x1a3   : > { %v848_v63 = vadd.f32 %v841_v61, %v822_v51  ;;  %858 = vrot.lane.b32.xlu0 %v850_v57, %s1045_s20 }
 0x1a4   : > { %v853_v0 = vmax.f32 %v747_v53, %v849_v60 }
 0x1a5   : > { %v852_v1 = vmax.f32 %v746_v62, %v848_v63 }
 0x1a6   : > { %864 = vrot.lane.b32.xlu1 %v853_v0, %s1045_s20 }
 0x1a7   : > { %862 = vrot.lane.b32.xlu0 %v852_v1, %s1045_s20 }
 0x213   : > { %v861_v2 = vpop.permute.xlu1 %860 }
 0x215   : > { %v859_v3 = vpop.permute.xlu0 %858 }
 0x216   : > { %v867_v56 = vsel %vm866_vm6, %v859_v3, %v861_v2 }
 0x217   : > { %v871_v59 = vmax.f32 %v850_v57, %v867_v56 }
 0x218   : > { %v865_v6 = vpop.permute.xlu1 %864 }
 0x219   : > { %v880_v7 = vadd.f32 %v968_v4, %v871_v59  ;;  %v863_v8 = vpop.permute.xlu0 %862 }
 0x21a   : > { %v868_v9 = vsel %vm866_vm6, %v863_v8, %v865_v6 }
 0x21b   : > { %v882_v10 = vmax.f32 %v880_v7, 0.0  ;;  %v872_v11 = vmax.f32 %v852_v1, %v868_v9 }
 0x21d   : > { %885 = vst.msk [vmem:[%s172_s25] sm:$0xff] %vm884_vm7, %v882_v10  ;;  %v881_v12 = vadd.f32 %v968_v4, %v872_v11 }
 0x21f   : > { %v883_v13 = vmax.f32 %v881_v12, 0.0 }
 0x221   : > { %887 = vst.msk [vmem:[%s172_s25 + $0x8] sm:$0x3f] %vm886_vm8, %v883_v13 }
 0x222 PF: > { %s13_s12 = sadd.s32 1, %s1038_s12  }
 0x223   : > { %p10_p5 = scmp.ge.s32.totalorder %s13_s12, 4  }
 0x225   :  { %12 = sbr.rel (!%p10_p5) target bundleno = 1 (0x1), region = 62 }

// kernel: convnet_forward.4
= control target key start
LH: loop header
LB: loop body
LE: loop exit
PB: predicated region body
PF: predicated region fallthrough
CT: control target
= control target key end

     0   :  { %s860_s12 = smov 0   ;;  %s1165_s0 = inlined_call_operand.vmem [shape: f32[32,84], index: 0, kind: input, shape index: {}]   ;;  %s1166_s1 = inlined_call_operand.vmem [shape: f32[84,800], index: 1, kind: input, shape index: {}]   ;;  %s1167_s2 = inlined_call_operand.vmem [shape: f32[1,1,80], index: 2, kind: input, shape index: {}]   ;;  %s1168_s3 = inlined_call_operand.vmem [shape: f32[2,5,80], index: 3, kind: output, shape index: {}]  }
   0x1 LB: > { %s866_s13 = sadd.s32 4294967295, %s833_s12   ;;  %p754_p0 = scmp.ge.s32.totalorder %s833_s12, 1  ;;  %s833_s12 = sphi %s860_s12, %s13_s12  }
   0x2   : > { %p138_p1 = scmp.lt.s32.totalorder %s833_s12, 3 }
   0x4   : > { %p139_p2 = pnand %p754_p0, %p138_p1 }
   0x5   : > { %s755_s17 = sshll.u32 (!%p139_p2), %s866_s13, 1  ;;  %s836_s25 = smov (!%p139_p2), 64  }
   0x6   : > { %142 = sbr.rel (%p139_p2) target bundleno = 506 (0x1fa), region = 32  ;;  %p937_p3 = scmp.lt.s32.totalorder (!%p139_p2), %s755_s17, 3 }
   0x7   : > { %s837_s26 = smov (!%p139_p2), 96   ;;  %s838_s27 = smov (!%p139_p2), 32  }
   0x8   : > { %s839_s28 = smov (!%p139_p2), 48   ;;  %p167_p4 = scmp.lt.s32.totalorder (!%p139_p2), %s866_s13, 1 }
   0xb   : > { %v244_v0 = vld [vmem:[%s1166_s1 + $0x238] sm:$0xf]  ;;  %vm257_vm0 = vcmask 1043456   ;;  %v246_v1 = vld [vmem:[%s1166_s1 + $0x248] sm:$0xf]  ;;  %v237_v2 = vld [vmem:[%s1166_s1 + $0x200] sm:$0xff] }
   0xc   : > { %758 = vmatprep.subr.msk.mxu0 %vm257_vm0, %v244_v0  ;;  %762 = vmatprep.subr.msk.mxu1 %vm257_vm0, %v246_v1  ;;  %v243_v3 = vld [vmem:[%s1166_s1 + $0x230] sm:$0xf]  ;;  %v245_v4 = vld [vmem:[%s1166_s1 + $0x240] sm:$0xf]  ;;  %v236_v6 = vld [vmem:[%s1166_s1 + $0x1f8] sm:$0xff]  ;;  %s1171_s17 = smov (!%p937_p3, %s755_s17), 3 }
   0xd   : > { %v239_v5 = vld [vmem:[%s1166_s1 + $0x210] sm:$0xff]  ;;  %759 = vmatpush1.msk.msra.mxu0 %vm257_vm0, %v243_v3  ;;  %763 = vmatpush1.msk.msra.mxu1 %vm257_vm0, %v245_v4  ;;  %v238_v7 = vld [vmem:[%s1166_s1 + $0x208] sm:$0xff]  ;;  %v232_v9 = vld [vmem:[%s1166_s1 + $0x1d8] sm:$0xff]  ;;  %s756_s14 = sshll.u32 %s1171_s17, 3  ;;  %vm250_vm1 = vcmask 687104   ;;  %v835_v45 = vmov 0.0  }
   0xe   : > { %v230_v8 = vld [vmem:[%s1166_s1 + $0x1c8] sm:$0xff]  ;;  %291 = vmatprep.subr.mxu0 %v237_v2  ;;  %368 = vmatprep.subr.mxu1 %v239_v5  ;;  %v229_v10 = vld [vmem:[%s1166_s1 + $0x1c0] sm:$0xff]  ;;  %v231_v11 = vld [vmem:[%s1166_s1 + $0x1d0] sm:$0xff]  ;;  %s165_s29 = scalar_lea.vmem %s1165_s0, %s756_s14  ;;  %vm591_vm2 = vcmask 785408   ;;  %vm605_vm3 = vcmask 523264   ;;  %vm619_vm4 = vcmask 261120  }
   0xf   : > { %292 = vmatpush1.msra.mxu0 %v236_v6  ;;  %369 = vmatpush1.msra.mxu1 %v238_v7  ;;  %v223_v12 = vld [vmem:[%s1166_s1 + $0x190] sm:$0xff]  ;;  %v225_v13 = vld [vmem:[%s1166_s1 + $0x1a0] sm:$0xff]  ;;  %v222_v14 = vld [vmem:[%s1166_s1 + $0x188] sm:$0xff]  ;;  %s1173_s13 = smov (!%p167_p4, %s866_s13), 1  ;;  %vm682_vm5 = vcmask 392192   ;;  %vm695_vm6 = vcmask 651264  }
  0x10   : > { %293 = vmatprep.subr.mxu0 %v230_v8  ;;  %370 = vmatprep.subr.mxu1 %v232_v9  ;;  %v224_v15 = vld [vmem:[%s1166_s1 + $0x198] sm:$0xff]  ;;  %v218_v17 = vld [vmem:[%s1166_s1 + $0x168] sm:$0xff]  ;;  %v215_v18 = vld [vmem:[%s1166_s1 + $0x150] sm:$0xff]  ;;  %s757_s4 = sshll.u32 %s1173_s13, 3 }
  0x11   : > { %294 = vmatpush1.msra.mxu0 %v229_v10  ;;  %371 = vmatpush1.msra.mxu1 %v231_v11  ;;  %v216_v16 = vld [vmem:[%s1166_s1 + $0x158] sm:$0xff]  ;;  %v217_v19 = vld [vmem:[%s1166_s1 + $0x160] sm:$0xff]  ;;  %v211_v21 = vld [vmem:[%s1166_s1 + $0x130] sm:$0xff]  ;;  %s170_s7 = scalar_lea.vmem %s1168_s3, %s757_s4 }
  0x12   : > { %295 = vmatprep.subr.mxu0 %v223_v12  ;;  %372 = vmatprep.subr.mxu1 %v225_v13  ;;  %v209_v20 = vld [vmem:[%s1166_s1 + $0x120] sm:$0xff]  ;;  %v208_v22 = vld [vmem:[%s1166_s1 + $0x118] sm:$0xff]  ;;  %v210_v23 = vld [vmem:[%s1166_s1 + $0x128] sm:$0xff] }
  0x13   : > { %296 = vmatpush1.msra.mxu0 %v222_v14  ;;  %373 = vmatpush1.msra.mxu1 %v224_v15  ;;  %v202_v24 = vld [vmem:[%s1166_s1 + $0xe8] sm:$0xff]  ;;  %v204_v25 = vld [vmem:[%s1166_s1 + $0xf8] sm:$0xff]  ;;  %v201_v26 = vld [vmem:[%s1166_s1 + $0xe0] sm:$0xff] }
  0x14   : > { %297 = vmatprep.subr.mxu0 %v216_v16  ;;  %374 = vmatprep.subr.mxu1 %v218_v17  ;;  %v203_v27 = vld [vmem:[%s1166_s1 + $0xf0] sm:$0xff]  ;;  %v197_v29 = vld [vmem:[%s1166_s1 + $0xc0] sm:$0xff]  ;;  %v194_v30 = vld [vmem:[%s1166_s1 + $0xa8] sm:$0xff] }
  0x15   : > { %298 = vmatpush1.msra.mxu0 %v215_v18  ;;  %375 = vmatpush1.msra.mxu1 %v217_v19  ;;  %v195_v28 = vld [vmem:[%s1166_s1 + $0xb0] sm:$0xff]  ;;  %v196_v31 = vld [vmem:[%s1166_s1 + $0xb8] sm:$0xff]  ;;  %v190_v33 = vld [vmem:[%s1166_s1 + $0x88] sm:$0xff] }
  0x16   : > { %299 = vmatprep.subr.mxu0 %v209_v20  ;;  %376 = vmatprep.subr.mxu1 %v211_v21  ;;  %v188_v32 = vld [vmem:[%s1166_s1 + $0x78] sm:$0xff]  ;;  %v187_v34 = vld [vmem:[%s1166_s1 + $0x70] sm:$0xff]  ;;  %v189_v35 = vld [vmem:[%s1166_s1 + $0x80] sm:$0xff] }
  0x17   : > { %300 = vmatpush1.msra.mxu0 %v208_v22  ;;  %377 = vmatpush1.msra.mxu1 %v210_v23  ;;  %v181_v36 = vld [vmem:[%s1166_s1 + $0x40] sm:$0xff]  ;;  %v183_v37 = vld [vmem:[%s1166_s1 + $0x50] sm:$0xff]  ;;  %v180_v38 = vld [vmem:[%s1166_s1 + $0x38] sm:$0xff] }
  0x18   : > { %301 = vmatprep.subr.mxu0 %v202_v24  ;;  %378 = vmatprep.subr.mxu1 %v204_v25  ;;  %v182_v39 = vld [vmem:[%s1166_s1 + $0x48] sm:$0xff]  ;;  %v176_v41 = vld [vmem:[%s1166_s1 + $0x18] sm:$0xff]  ;;  %v173_v42 = vld [vmem:[%s1166_s1] sm:$0xff] }
  0x19   : > { %302 = vmatpush1.msra.mxu0 %v201_v26  ;;  %379 = vmatpush1.msra.mxu1 %v203_v27  ;;  %v174_v40 = vld [vmem:[%s1166_s1 + $0x8] sm:$0xff]  ;;  %v175_v43 = vld [vmem:[%s1166_s1 + $0x10] sm:$0xff]  ;;  %v1023_v44 = vld [vmem:[%s165_s29] sm:$0xff] }
  0x1a   : > { %303 = vmatprep.subr.mxu0 %v195_v28  ;;  %380 = vmatprep.subr.mxu1 %v197_v29  ;;  %v248_v46 = vld [vmem:[%s1166_s1 + $0x258] sm:$0xf]  ;;  %v247_v47 = vld [vmem:[%s1166_s1 + $0x250] sm:$0xf]  ;;  %v241_v48 = vld [vmem:[%s1166_s1 + $0x220] sm:$0xff] }
  0x1b   : > { %304 = vmatpush1.msra.mxu0 %v194_v30  ;;  %381 = vmatpush1.msra.mxu1 %v196_v31  ;;  %v249_v49 = vld [vmem:[%s1166_s1 + $0x260] sm:$0xf]  ;;  %v240_v50 = vld [vmem:[%s1166_s1 + $0x218] sm:$0xff]  ;;  %v1048_v51 = vld [vmem:[%s165_s29 + $0x8] sm:$0xff] }
  0x1c   : > { %305 = vmatprep.subr.mxu0 %v188_v32  ;;  %382 = vmatprep.subr.mxu1 %v190_v33  ;;  %v234_v52 = vld [vmem:[%s1166_s1 + $0x1e8] sm:$0xff]  ;;  %v233_v53 = vld [vmem:[%s1166_s1 + $0x1e0] sm:$0xff]  ;;  %v227_v54 = vld [vmem:[%s1166_s1 + $0x1b0] sm:$0xff] }
  0x1d   : > { %306 = vmatpush1.msra.mxu0 %v187_v34  ;;  %383 = vmatpush1.msra.mxu1 %v189_v35  ;;  %v226_v55 = vld [vmem:[%s1166_s1 + $0x1a8] sm:$0xff]  ;;  %v220_v57 = vld [vmem:[%s1166_s1 + $0x178] sm:$0xff]  ;;  %v219_v58 = vld [vmem:[%s1166_s1 + $0x170] sm:$0xff] }
  0x1e   : > { %307 = vmatprep.subr.mxu0 %v181_v36  ;;  %384 = vmatprep.subr.mxu1 %v183_v37  ;;  %v242_v56 = vld [vmem:[%s1166_s1 + $0x228] sm:$0xff]  ;;  %v235_v59 = vld [vmem:[%s1166_s1 + $0x1f0] sm:$0xff]  ;;  %v213_v60 = vld [vmem:[%s1166_s1 + $0x140] sm:$0xff] }
  0x1f   : > { %308 = vmatpush1.msra.mxu0 %v180_v38  ;;  %385 = vmatpush1.msra.mxu1 %v182_v39  ;;  %v212_v61 = vld [vmem:[%s1166_s1 + $0x138] sm:$0xff]  ;;  %v206_v63 = vld [vmem:[%s1166_s1 + $0x108] sm:$0xff]  ;;  %v205_v0 = vld [vmem:[%s1166_s1 + $0x100] sm:$0xff] }
  0x20   : > { %309 = vmatprep.subr.mxu0 %v174_v40  ;;  %386 = vmatprep.subr.mxu1 %v176_v41  ;;  %v228_v62 = vld [vmem:[%s1166_s1 + $0x1b8] sm:$0xff]  ;;  %v221_v1 = vld [vmem:[%s1166_s1 + $0x180] sm:$0xff]  ;;  %v199_v2 = vld [vmem:[%s1166_s1 + $0xd0] sm:$0xff] }
  0x21   : > { %310 = vmatpush1.msra.mxu0 %v173_v42  ;;  %343 = vmatprep.mubr.f32.mxu0 %v835_v45  ;;  %v198_v3 = vld [vmem:[%s1166_s1 + $0xc8] sm:$0xff]  ;;  %v192_v5 = vld [vmem:[%s1166_s1 + $0x98] sm:$0xff]  ;;  %v191_v6 = vld [vmem:[%s1166_s1 + $0x90] sm:$0xff] }
  0x22   : > { %387 = vmatpush1.msra.mxu1 %v175_v43  ;;  %420 = vmatprep.mubr.f32.mxu1 %v835_v45  ;;  %v214_v4 = vld [vmem:[%s1166_s1 + $0x148] sm:$0xff]  ;;  %v207_v7 = vld [vmem:[%s1166_s1 + $0x110] sm:$0xff]  ;;  %v185_v8 = vld [vmem:[%s1166_s1 + $0x60] sm:$0xff] }
  0x23   : > { %760 = vmatmul.mubr.msk.f32.vlgmr.msra.gmra.mxu0 %vm250_vm1, %v1023_v44  ;;  %764 = vmatmul.mubr.msk.f32.vlgmr.msra.gmra.mxu1 %vm250_vm1, %v1023_v44  ;;  %v184_v9 = vld [vmem:[%s1166_s1 + $0x58] sm:$0xff]  ;;  %v178_v11 = vld [vmem:[%s1166_s1 + $0x28] sm:$0xff]  ;;  %v177_v12 = vld [vmem:[%s1166_s1 + $0x20] sm:$0xff] }
  0x24   : > { %766 = vmatprep.subr.msk.mxu0 %vm257_vm0, %v248_v46  ;;  %426 = vmatprep.mubr.f32.mxu1 %v835_v45  ;;  %v200_v10 = vld [vmem:[%s1166_s1 + $0xd8] sm:$0xff]  ;;  %v193_v13 = vld [vmem:[%s1166_s1 + $0xa0] sm:$0xff]  ;;  %v186_v14 = vld [vmem:[%s1166_s1 + $0x68] sm:$0xff] }
  0x25   : > { %767 = vmatpush1.msk.msra.mxu0 %vm257_vm0, %v247_v47  ;;  %349 = vmatprep.mubr.f32.mxu0 %v835_v45  ;;  %v179_v15 = vld [vmem:[%s1166_s1 + $0x30] sm:$0xff] }
  0x26   : > { %445 = vmatprep.subr.mxu0 %v241_v48  ;;  %789 = vmatprep.subr.msk.mxu1 %vm257_vm0, %v249_v49 }
  0x27   : > { %446 = vmatpush1.msra.mxu0 %v240_v50  ;;  %765 = vmatmul.mubr.msk.f32.gmra.mxu1 %vm250_vm1, %v1048_v51 }
  0x28   : > { %447 = vmatprep.subr.mxu0 %v234_v52  ;;  %761 = vmatmul.mubr.msk.f32.gmra.mxu0 %vm250_vm1, %v1048_v51 }
  0x29   : > { %448 = vmatpush1.msra.mxu0 %v233_v53  ;;  %497 = vmatprep.mubr.f32.mxu0 %v835_v45 }
  0x2a   : > { %449 = vmatprep.subr.mxu0 %v227_v54  ;;  %790 = vmatpush3.msk.msra.mxu1 %vm257_vm0, %v249_v49 }
  0x2b   : > { %450 = vmatpush1.msra.mxu0 %v226_v55  ;;  %791 = vmatprep.subr.mxu1 %v242_v56 }
  0x2c   : > { %451 = vmatprep.subr.mxu0 %v220_v57  ;;  %792 = vmatpush3.msra.mxu1 %v242_v56 }
  0x2d   : > { %452 = vmatpush1.msra.mxu0 %v219_v58  ;;  %793 = vmatprep.subr.mxu1 %v235_v59 }
  0x2e   : > { %453 = vmatprep.subr.mxu0 %v213_v60  ;;  %794 = vmatpush3.msra.mxu1 %v235_v59 }
  0x2f   : > { %454 = vmatpush1.msra.mxu0 %v212_v61  ;;  %795 = vmatprep.subr.mxu1 %v228_v62 }
  0x30   : > { %455 = vmatprep.subr.mxu0 %v206_v63  ;;  %796 = vmatpush3.msra.mxu1 %v228_v62 }
  0x31   : > { %456 = vmatpush1.msra.mxu0 %v205_v0  ;;  %797 = vmatprep.subr.mxu1 %v221_v1 }
  0x32   : > { %457 = vmatprep.subr.mxu0 %v199_v2  ;;  %798 = vmatpush3.msra.mxu1 %v221_v1 }
  0x33   : > { %458 = vmatpush1.msra.mxu0 %v198_v3  ;;  %799 = vmatprep.subr.mxu1 %v214_v4 }
  0x34   : > { %459 = vmatprep.subr.mxu0 %v192_v5  ;;  %800 = vmatpush3.msra.mxu1 %v214_v4 }
  0x35   : > { %460 = vmatpush1.msra.mxu0 %v191_v6  ;;  %801 = vmatprep.subr.mxu1 %v207_v7 }
  0x36   : > { %461 = vmatprep.subr.mxu0 %v185_v8  ;;  %802 = vmatpush3.msra.mxu1 %v207_v7 }
  0x37   : > { %462 = vmatpush1.msra.mxu0 %v184_v9  ;;  %803 = vmatprep.subr.mxu1 %v200_v10 }
  0x38   : > { %463 = vmatprep.subr.mxu0 %v178_v11  ;;  %804 = vmatpush3.msra.mxu1 %v200_v10 }
  0x39   : > { %464 = vmatpush1.msra.mxu0 %v177_v12  ;;  %805 = vmatprep.subr.mxu1 %v193_v13 }
  0x3a   : > { %768 = vmatmul.mubr.msk.f32.vlgmr.msra.gmra.mxu0 %vm250_vm1, %v1023_v44  ;;  %806 = vmatpush3.msra.mxu1 %v193_v13 }
  0x3b   : > { %503 = vmatprep.mubr.f32.mxu0 %v835_v45  ;;  %807 = vmatprep.subr.mxu1 %v186_v14 }
  0x3c   : > { %808 = vmatpush3.msra.mxu1 %v186_v14  ;;  %811 = vmatprep.mubr.msk.f32.mxu1 %vm250_vm1, %v1023_v44 }
  0x3d   : > { %809 = vmatprep.subr.mxu1 %v179_v15 }
  0x3e   : > { %769 = vmatmul.mubr.msk.f32.gmra.mxu0 %vm250_vm1, %v1048_v51  ;;  %810 = vmatpush3.msra.mxu1 %v179_v15 }
  0x3f   : > { %812 = vmatmul.mubr.msk.f32.vlgmr.msra.gmra.mxu1 %vm250_vm1, %v1048_v51 }
  0xe3   : > { %v345_v16 = vpop.f32.mrf.mxu0  ;;  %v422_v17 = vpop.f32.mrf.mxu1 }
  0xe4   : > { %v599_v18 = vrot.slane %v422_v17, 1 }
  0xe5   : > { %v347_v19 = vpop.f32.mrf.mxu0  ;;  %v424_v20 = vpop.f32.mrf.mxu1 }
  0xe6   : > { %601 = vrot.lane.b32.xlu0 %v599_v18, %s836_s25  ;;  %637 = vrot.lane.b32.xlu1 %v599_v18, %s837_s26  ;;  %v634_v22 = vrot.slane %v347_v19, 1  ;;  %v600_v24 = vrot.slane %v424_v20, 1  ;;  %v655_v29 = vrot.slane %v424_v20, 2 }
  0xe7   : > { %v428_v21 = vpop.f32.mrf.mxu1 }
  0xe8   : > { %v351_v23 = vpop.f32.mrf.mxu0  ;;  %v644_v27 = vrot.slane %v428_v21, 1 }
  0xe9   : > { %v430_v26 = vpop.f32.mrf.mxu1 }
  0xea   : > { %589 = vrot.lane.b32.xlu0 %v428_v21, %s837_s26  ;;  %635 = vrot.lane.b32.xlu1 %v634_v22, %s837_s26  ;;  %v353_v25 = vpop.f32.mrf.mxu0  ;;  %v613_v28 = vrot.slane %v430_v26, 1 }
  0xee   : > { %603 = vrot.lane.b32.xlu1 %v600_v24, %s836_s25  ;;  %587 = vrot.lane.b32.xlu0 %v353_v25, %s837_s26 }
  0xf2   : > { %647 = vrot.lane.b32.xlu1 %v613_v28, %s836_s25  ;;  %645 = vrot.lane.b32.xlu0 %v644_v27, %s836_s25 }
  0xf6   : > { %615 = vrot.lane.b32.xlu0 %v613_v28, %s838_s27 }
  0xfa   : > { %v499_v30 = vpop.f32.mrf.mxu0  ;;  %657 = vrot.lane.b32.xlu0 %v655_v29, %s838_s27 }
  0xfb   : > { %v656_v34 = vrot.slane %v499_v30, 2 }
  0xfc   : > { %v501_v31 = vpop.f32.mrf.mxu0 }
  0xfd   : > { %v627_v5 = vrot.slane %v501_v31, 2 }
  0xfe   : > { %v505_v32 = vpop.f32.mrf.mxu0 }
  0xff   : > { %v614_v33 = vrot.slane %v505_v32, 1  ;;  %v813_v44 = vpop.f32.mrf.mxu1 }
 0x100   : > { %v507_v58 = vpop.f32.mrf.mxu0  ;;  %v669_v60 = vrot.slane %v813_v44, 2 }
 0x101   : > { %617 = vrot.lane.b32.xlu1 %v614_v33, %s838_s27  ;;  %v576_v50 = vpop.f32.mrf.mxu1  ;;  %v668_v6 = vrot.slane %v507_v58, 2 }
 0x102   : > { %v628_v61 = vrot.slane %v576_v50, 2 }
 0x105   : > { %659 = vrot.lane.b32.xlu1 %v656_v34, %s838_s27 }
 0x158   : > { %v602_v35 = vpop.permute.xlu0 %601  ;;  %v638_v36 = vpop.permute.xlu1 %637 }
 0x159   : > { %v643_v52 = vadd.f32 %v638_v36, %v353_v25 }
 0x15c   : > { %v590_v37 = vpop.permute.xlu0 %589  ;;  %v636_v38 = vpop.permute.xlu1 %635 }
 0x15d   : > { %v596_v47 = vadd.f32 %v590_v37, %v347_v19  ;;  %v639_v48 = vsel %vm591_vm2, %v636_v38, %v638_v36 }
 0x15e   : > { %v642_v56 = vadd.f32 %v639_v48, %v351_v23 }
 0x160   : > { %v588_v39 = vpop.permute.xlu0 %587  ;;  %v604_v40 = vpop.permute.xlu1 %603 }
 0x161   : > { %v592_v42 = vsel %vm591_vm2, %v588_v39, %v590_v37  ;;  %v606_v49 = vsel %vm605_vm3, %v602_v35, %v604_v40  ;;  %v610_v53 = vadd.f32 %v604_v40, %v596_v47 }
 0x162   : > { %v595_v45 = vadd.f32 %v592_v42, %v345_v16  ;;  %v773_v16 = vld [vmem:[%s1167_s2] ss:$0 sm:$0xff] }
 0x164   : > { %v646_v41 = vpop.permute.xlu0 %645  ;;  %v648_v43 = vpop.permute.xlu1 %647  ;;  %v609_v57 = vadd.f32 %v606_v49, %v595_v45 }
 0x165   : > { %v649_v54 = vsel %vm605_vm3, %v646_v41, %v648_v43  ;;  %v653_v59 = vadd.f32 %v648_v43, %v643_v52 }
 0x166   : > { %v652_v63 = vadd.f32 %v649_v54, %v642_v56 }
 0x168   : > { %v616_v46 = vpop.permute.xlu0 %615 }
 0x16c   : > { %v658_v0 = vpop.permute.xlu0 %657 }
 0x173   : > { %v618_v51 = vpop.permute.xlu1 %617 }
 0x174   : > { %v620_v55 = vsel %vm619_vm4, %v616_v46, %v618_v51  ;;  %v624_v62 = vadd.f32 %v618_v51, %v610_v53 }
 0x175   : > { %v623_v1 = vadd.f32 %v620_v55, %v609_v57 }
 0x176   : > { %v632_v8 = vadd.f32 %v628_v61, %v624_v62 }
 0x177   : > { %v660_v2 = vpop.permute.xlu1 %659  ;;  %v631_v10 = vadd.f32 %v627_v5, %v623_v1 }
 0x178   : > { %v661_v3 = vsel %vm619_vm4, %v658_v0, %v660_v2  ;;  %v665_v4 = vadd.f32 %v660_v2, %v653_v59 }
 0x179   : > { %v664_v7 = vadd.f32 %v661_v3, %v652_v63 }
 0x17a   : > { %v673_v9 = vadd.f32 %v669_v60, %v665_v4 }
 0x17b   : > { %v672_v11 = vadd.f32 %v668_v6, %v664_v7 }
 0x17c   : > { %v675_v12 = vmax.f32 %v632_v8, %v673_v9 }
 0x17d   : > { %v674_v13 = vmax.f32 %v631_v10, %v672_v11 }
 0x17e   : > { %680 = vrot.lane.b32.xlu1 %v675_v12, %s839_s28 }
 0x17f   : > { %678 = vrot.lane.b32.xlu0 %v674_v13, %s839_s28 }
 0x1f0   : > { %v681_v14 = vpop.permute.xlu1 %680 }
 0x1f1   : > { %v679_v15 = vpop.permute.xlu0 %678 }
 0x1f2   : > { %v683_v17 = vsel %vm682_vm5, %v679_v15, %v681_v14 }
 0x1f3   : > { %v685_v18 = vmax.f32 %v674_v13, %v683_v17 }
 0x1f5   : > { %v693_v19 = vadd.f32 %v773_v16, %v685_v18 }
 0x1f7   : > { %v694_v20 = vmax.f32 %v693_v19, 0.0 }
 0x1f9   : > { %696 = vst.msk [vmem:[%s170_s7] sm:$0x1f] %vm695_vm6, %v694_v20 }
 0x1fa PF: > { %s13_s12 = sadd.s32 1, %s833_s12  }
 0x1fb   : > { %p10_p5 = scmp.ge.s32.totalorder %s13_s12, 4  }
 0x1fd   :  { %12 = sbr.rel (!%p10_p5) target bundleno = 1 (0x1), region = 62 }

// kernel: convnet_forward.5
= control target key start
LH: loop header
LB: loop body
LE: loop exit
PB: predicated region body
PF: predicated region fallthrough
CT: control target
= control target key end

     0   :  { %vm614_vm0 = vmmov 0   ;;  %s1001_s1 = inlined_call_operand.vmem [shape: f32[512,128], index: 1, kind: input, shape index: {}]   ;;  %s1002_s0 = inlined_call_operand.vmem [shape: f32[8,512], index: 0, kind: input, shape index: {}]   ;;  %s1003_s3 = inlined_call_operand.vmem [shape: f32[128,128], index: 3, kind: input, shape index: {}]   ;;  %s1004_s5 = inlined_call_operand.vmem [shape: f32[128,128], index: 5, kind: input, shape index: {}]   ;;  %s1005_s2 = inlined_call_operand.vmem [shape: f32[1,128], index: 2, kind: input, shape index: {}]   ;;  %s1006_s4 = inlined_call_operand.vmem [shape: f32[1,128], index: 4, kind: input, shape index: {}]   ;;  %s1007_s6 = inlined_call_operand.vmem [shape: f32[1,128], index: 6, kind: input, shape index: {}]   ;;  %s1008_s7 = inlined_call_operand.vmem [shape: f32[8,128], index: 7, kind: output, shape index: {}]  }
   0x1   :  { %v61_v0 = vld [vmem:[%s1001_s1 + $0xf8] sm:$0xff]  ;;  %v60_v4 = vld [vmem:[%s1001_s1 + $0xf0] sm:$0xff]  ;;  %v59_v8 = vld [vmem:[%s1001_s1 + $0xe8] sm:$0xff] }
   0x2   :  { %v93_v1 = vld [vmem:[%s1001_s1 + $0x1f8] sm:$0xff]  ;;  %437 = vmatprep.subr.mxu0 %v61_v0  ;;  %v92_v5 = vld [vmem:[%s1001_s1 + $0x1f0] sm:$0xff]  ;;  %v91_v9 = vld [vmem:[%s1001_s1 + $0x1e8] sm:$0xff] }
   0x3   :  { %v45_v2 = vld [vmem:[%s1001_s1 + $0x78] sm:$0xff]  ;;  %472 = vmatprep.subr.mxu1 %v93_v1  ;;  %v44_v6 = vld [vmem:[%s1001_s1 + $0x70] sm:$0xff]  ;;  %v43_v10 = vld [vmem:[%s1001_s1 + $0x68] sm:$0xff] }
   0x4   :  { %v77_v3 = vld [vmem:[%s1001_s1 + $0x178] sm:$0xff]  ;;  %438 = vmatpush3.msra.mxu0 %v45_v2  ;;  %v76_v7 = vld [vmem:[%s1001_s1 + $0x170] sm:$0xff]  ;;  %v75_v11 = vld [vmem:[%s1001_s1 + $0x168] sm:$0xff] }
   0x5   :  { %473 = vmatpush3.msra.mxu1 %v77_v3  ;;  %439 = vmatprep.subr.mxu0 %v60_v4  ;;  %v58_v12 = vld [vmem:[%s1001_s1 + $0xe0] sm:$0xff]  ;;  %v57_v16 = vld [vmem:[%s1001_s1 + $0xd8] sm:$0xff]  ;;  %v56_v20 = vld [vmem:[%s1001_s1 + $0xd0] sm:$0xff] }
   0x6   :  { %474 = vmatprep.subr.mxu1 %v92_v5  ;;  %440 = vmatpush3.msra.mxu0 %v44_v6  ;;  %v90_v13 = vld [vmem:[%s1001_s1 + $0x1e0] sm:$0xff]  ;;  %v89_v17 = vld [vmem:[%s1001_s1 + $0x1d8] sm:$0xff]  ;;  %v88_v21 = vld [vmem:[%s1001_s1 + $0x1d0] sm:$0xff]  ;;  %v613_v5 = vmov 0.0  }
   0x7   :  { %475 = vmatpush3.msra.mxu1 %v76_v7  ;;  %441 = vmatprep.subr.mxu0 %v59_v8  ;;  %v42_v14 = vld [vmem:[%s1001_s1 + $0x60] sm:$0xff]  ;;  %v41_v18 = vld [vmem:[%s1001_s1 + $0x58] sm:$0xff]  ;;  %v40_v22 = vld [vmem:[%s1001_s1 + $0x50] sm:$0xff] }
   0x8   :  { %476 = vmatprep.subr.mxu1 %v91_v9  ;;  %v74_v15 = vld [vmem:[%s1001_s1 + $0x160] sm:$0xff]  ;;  %442 = vmatpush3.msra.mxu0 %v43_v10  ;;  %v73_v19 = vld [vmem:[%s1001_s1 + $0x158] sm:$0xff]  ;;  %v72_v23 = vld [vmem:[%s1001_s1 + $0x150] sm:$0xff] }
   0x9   :  { %477 = vmatpush3.msra.mxu1 %v75_v11  ;;  %443 = vmatprep.subr.mxu0 %v58_v12  ;;  %v55_v24 = vld [vmem:[%s1001_s1 + $0xc8] sm:$0xff]  ;;  %v54_v28 = vld [vmem:[%s1001_s1 + $0xc0] sm:$0xff]  ;;  %v53_v32 = vld [vmem:[%s1001_s1 + $0xb8] sm:$0xff] }
   0xa   :  { %478 = vmatprep.subr.mxu1 %v90_v13  ;;  %444 = vmatpush3.msra.mxu0 %v42_v14  ;;  %v87_v25 = vld [vmem:[%s1001_s1 + $0x1c8] sm:$0xff]  ;;  %v86_v29 = vld [vmem:[%s1001_s1 + $0x1c0] sm:$0xff]  ;;  %v85_v33 = vld [vmem:[%s1001_s1 + $0x1b8] sm:$0xff] }
   0xb   :  { %479 = vmatpush3.msra.mxu1 %v74_v15  ;;  %445 = vmatprep.subr.mxu0 %v57_v16  ;;  %v39_v26 = vld [vmem:[%s1001_s1 + $0x48] sm:$0xff]  ;;  %v38_v30 = vld [vmem:[%s1001_s1 + $0x40] sm:$0xff]  ;;  %v37_v34 = vld [vmem:[%s1001_s1 + $0x38] sm:$0xff] }
   0xc   :  { %480 = vmatprep.subr.mxu1 %v89_v17  ;;  %446 = vmatpush3.msra.mxu0 %v41_v18  ;;  %v71_v27 = vld [vmem:[%s1001_s1 + $0x148] sm:$0xff]  ;;  %v70_v31 = vld [vmem:[%s1001_s1 + $0x140] sm:$0xff]  ;;  %v69_v35 = vld [vmem:[%s1001_s1 + $0x138] sm:$0xff] }
   0xd   :  { %481 = vmatpush3.msra.mxu1 %v73_v19  ;;  %447 = vmatprep.subr.mxu0 %v56_v20  ;;  %v52_v36 = vld [vmem:[%s1001_s1 + $0xb0] sm:$0xff]  ;;  %v51_v40 = vld [vmem:[%s1001_s1 + $0xa8] sm:$0xff]  ;;  %v50_v44 = vld [vmem:[%s1001_s1 + $0xa0] sm:$0xff] }
   0xe   :  { %482 = vmatprep.subr.mxu1 %v88_v21  ;;  %448 = vmatpush3.msra.mxu0 %v40_v22  ;;  %v84_v37 = vld [vmem:[%s1001_s1 + $0x1b0] sm:$0xff]  ;;  %v83_v41 = vld [vmem:[%s1001_s1 + $0x1a8] sm:$0xff]  ;;  %v82_v45 = vld [vmem:[%s1001_s1 + $0x1a0] sm:$0xff] }
   0xf   :  { %483 = vmatpush3.msra.mxu1 %v72_v23  ;;  %449 = vmatprep.subr.mxu0 %v55_v24  ;;  %v36_v38 = vld [vmem:[%s1001_s1 + $0x30] sm:$0xff]  ;;  %v35_v42 = vld [vmem:[%s1001_s1 + $0x28] sm:$0xff]  ;;  %v34_v46 = vld [vmem:[%s1001_s1 + $0x20] sm:$0xff] }
  0x10   :  { %484 = vmatprep.subr.mxu1 %v87_v25  ;;  %450 = vmatpush3.msra.mxu0 %v39_v26  ;;  %v68_v39 = vld [vmem:[%s1001_s1 + $0x130] sm:$0xff]  ;;  %v67_v43 = vld [vmem:[%s1001_s1 + $0x128] sm:$0xff]  ;;  %v66_v47 = vld [vmem:[%s1001_s1 + $0x120] sm:$0xff] }
  0x11   :  { %485 = vmatpush3.msra.mxu1 %v71_v27  ;;  %451 = vmatprep.subr.mxu0 %v54_v28  ;;  %v49_v48 = vld [vmem:[%s1001_s1 + $0x98] sm:$0xff]  ;;  %v48_v52 = vld [vmem:[%s1001_s1 + $0x90] sm:$0xff]  ;;  %v47_v56 = vld [vmem:[%s1001_s1 + $0x88] sm:$0xff] }
  0x12   :  { %486 = vmatprep.subr.mxu1 %v86_v29  ;;  %452 = vmatpush3.msra.mxu0 %v38_v30  ;;  %v81_v49 = vld [vmem:[%s1001_s1 + $0x198] sm:$0xff]  ;;  %v80_v53 = vld [vmem:[%s1001_s1 + $0x190] sm:$0xff]  ;;  %v79_v57 = vld [vmem:[%s1001_s1 + $0x188] sm:$0xff] }
  0x13   :  { %487 = vmatpush3.msra.mxu1 %v70_v31  ;;  %453 = vmatprep.subr.mxu0 %v53_v32  ;;  %v33_v50 = vld [vmem:[%s1001_s1 + $0x18] sm:$0xff]  ;;  %v32_v54 = vld [vmem:[%s1001_s1 + $0x10] sm:$0xff]  ;;  %v31_v58 = vld [vmem:[%s1001_s1 + $0x8] sm:$0xff] }
  0x14   :  { %488 = vmatprep.subr.mxu1 %v85_v33  ;;  %454 = vmatpush3.msra.mxu0 %v37_v34  ;;  %v65_v51 = vld [vmem:[%s1001_s1 + $0x118] sm:$0xff]  ;;  %v64_v55 = vld [vmem:[%s1001_s1 + $0x110] sm:$0xff]  ;;  %v63_v59 = vld [vmem:[%s1001_s1 + $0x108] sm:$0xff] }
  0x15   :  { %489 = vmatpush3.msra.mxu1 %v69_v35  ;;  %455 = vmatprep.subr.mxu0 %v52_v36  ;;  %v46_v60 = vld [vmem:[%s1001_s1 + $0x80] sm:$0xff]  ;;  %v27_v63 = vld [vmem:[%s1002_s0 + $0x8] sm:$0xff]  ;;  %v29_v1 = vld [vmem:[%s1002_s0 + $0x18] sm:$0xff] }
  0x16   :  { %490 = vmatprep.subr.mxu1 %v84_v37  ;;  %456 = vmatpush3.msra.mxu0 %v36_v38  ;;  %v78_v61 = vld [vmem:[%s1001_s1 + $0x180] sm:$0xff]  ;;  %v28_v3 = vld [vmem:[%s1002_s0 + $0x10] sm:$0xff]  ;;  %v257_v4 = vld [vmem:[%s1003_s3 + $0x78] sm:$0xff] }
  0x17   :  { %491 = vmatpush3.msra.mxu1 %v68_v39  ;;  %457 = vmatprep.subr.mxu0 %v51_v40  ;;  %v30_v62 = vld [vmem:[%s1001_s1] sm:$0xff]  ;;  %v256_v6 = vld [vmem:[%s1003_s3 + $0x70] sm:$0xff]  ;;  %v255_v7 = vld [vmem:[%s1003_s3 + $0x68] sm:$0xff] }
  0x18   :  { %492 = vmatprep.subr.mxu1 %v83_v41  ;;  %458 = vmatpush3.msra.mxu0 %v35_v42  ;;  %v62_v0 = vld [vmem:[%s1001_s1 + $0x100] sm:$0xff]  ;;  %v253_v9 = vld [vmem:[%s1003_s3 + $0x58] sm:$0xff]  ;;  %v252_v10 = vld [vmem:[%s1003_s3 + $0x50] sm:$0xff] }
  0x19   :  { %493 = vmatpush3.msra.mxu1 %v67_v43  ;;  %459 = vmatprep.subr.mxu0 %v50_v44  ;;  %v26_v2 = vld [vmem:[%s1002_s0] sm:$0xff]  ;;  %v251_v11 = vld [vmem:[%s1003_s3 + $0x48] sm:$0xff]  ;;  %v249_v13 = vld [vmem:[%s1003_s3 + $0x38] sm:$0xff] }
  0x1a   :  { %494 = vmatprep.subr.mxu1 %v82_v45  ;;  %460 = vmatpush3.msra.mxu0 %v34_v46  ;;  %v254_v8 = vld [vmem:[%s1003_s3 + $0x60] sm:$0xff]  ;;  %v248_v14 = vld [vmem:[%s1003_s3 + $0x30] sm:$0xff]  ;;  %v247_v15 = vld [vmem:[%s1003_s3 + $0x28] sm:$0xff] }
  0x1b   :  { %495 = vmatpush3.msra.mxu1 %v66_v47  ;;  %461 = vmatprep.subr.mxu0 %v49_v48  ;;  %v250_v12 = vld [vmem:[%s1003_s3 + $0x40] sm:$0xff]  ;;  %v245_v17 = vld [vmem:[%s1003_s3 + $0x18] sm:$0xff]  ;;  %v244_v18 = vld [vmem:[%s1003_s3 + $0x10] sm:$0xff] }
  0x1c   :  { %496 = vmatprep.subr.mxu1 %v81_v49  ;;  %462 = vmatpush3.msra.mxu0 %v33_v50  ;;  %v246_v16 = vld [vmem:[%s1003_s3 + $0x20] sm:$0xff]  ;;  %v243_v19 = vld [vmem:[%s1003_s3 + $0x8] sm:$0xff]  ;;  %v351_v21 = vld [vmem:[%s1004_s5 + $0x78] sm:$0xff] }
  0x1d   :  { %497 = vmatpush3.msra.mxu1 %v65_v51  ;;  %463 = vmatprep.subr.mxu0 %v48_v52  ;;  %v242_v20 = vld [vmem:[%s1003_s3] sm:$0xff]  ;;  %v350_v22 = vld [vmem:[%s1004_s5 + $0x70] sm:$0xff]  ;;  %v349_v23 = vld [vmem:[%s1004_s5 + $0x68] sm:$0xff] }
  0x1e   :  { %498 = vmatprep.subr.mxu1 %v80_v53  ;;  %464 = vmatpush3.msra.mxu0 %v32_v54  ;;  %v348_v24 = vld [vmem:[%s1004_s5 + $0x60] sm:$0xff]  ;;  %v347_v25 = vld [vmem:[%s1004_s5 + $0x58] sm:$0xff]  ;;  %v346_v26 = vld [vmem:[%s1004_s5 + $0x50] sm:$0xff] }
  0x1f   :  { %499 = vmatpush3.msra.mxu1 %v64_v55  ;;  %465 = vmatprep.subr.mxu0 %v47_v56  ;;  %v345_v27 = vld [vmem:[%s1004_s5 + $0x48] sm:$0xff]  ;;  %v344_v28 = vld [vmem:[%s1004_s5 + $0x40] sm:$0xff]  ;;  %v343_v29 = vld [vmem:[%s1004_s5 + $0x38] sm:$0xff] }
  0x20   :  { %500 = vmatprep.subr.mxu1 %v79_v57  ;;  %466 = vmatpush3.msra.mxu0 %v31_v58  ;;  %v342_v30 = vld [vmem:[%s1004_s5 + $0x30] sm:$0xff]  ;;  %v341_v31 = vld [vmem:[%s1004_s5 + $0x28] sm:$0xff]  ;;  %v340_v32 = vld [vmem:[%s1004_s5 + $0x20] sm:$0xff] }
  0x21   :  { %501 = vmatpush3.msra.mxu1 %v63_v59  ;;  %467 = vmatprep.subr.mxu0 %v46_v60  ;;  %v339_v33 = vld [vmem:[%s1004_s5 + $0x18] sm:$0xff]  ;;  %v434_v36 = vld [vmem:[%s1005_s2] ss:$0 sm:$0xff]  ;;  %v338_v44 = vld [vmem:[%s1004_s5 + $0x10] sm:$0xff] }
  0x22   :  { %502 = vmatprep.subr.mxu1 %v78_v61  ;;  %468 = vmatpush3.msra.mxu0 %v30_v62  ;;  %v337_v45 = vld [vmem:[%s1004_s5 + $0x8] sm:$0xff]  ;;  %v336_v46 = vld [vmem:[%s1004_s5] sm:$0xff] }
  0x23   :  { %165 = vmatprep.mubr.f32.mxu0 %v27_v63  ;;  %503 = vmatpush3.msra.mxu1 %v62_v0  ;;  %v435_v47 = vld [vmem:[%s1006_s4] ss:$0 sm:$0xff] }
  0x24   :  { %235 = vmatprep.mubr.f32.mxu1 %v29_v1  ;;  %166 = vmatmul.mubr.f32.vlgmr.msra.gmra.mxu0 %v26_v2  ;;  %v436_v52 = vld [vmem:[%s1007_s6] ss:$0 sm:$0xff] }
  0x25   :  { %236 = vmatmul.mubr.f32.vlgmr.msra.gmra.mxu1 %v28_v3  ;;  %541 = vmatprep.subr.mxu0 %v613_v5 }
  0x26   :  { %576 = vmatprep.subr.mxu1 %v613_v5  ;;  %542 = vmatpush3.msra.mxu0 %v257_v4 }
  0x27   :  { %543 = vmatprep.subr.mxu0 %v613_v5  ;;  %573 = vmatprep.mubr.msk.f32.mxu0 %vm614_vm0, %v613_v5 }
  0x28   :  { %544 = vmatpush3.msra.mxu0 %v256_v6  ;;  %608 = vmatprep.mubr.msk.f32.mxu1 %vm614_vm0, %v613_v5 }
  0x29   :  { %545 = vmatprep.subr.mxu0 %v613_v5  ;;  %577 = vmatpush3.msra.mxu1 %v351_v21 }
  0x2a   :  { %546 = vmatpush3.msra.mxu0 %v255_v7  ;;  %578 = vmatprep.subr.mxu1 %v613_v5 }
  0x2b   :  { %547 = vmatprep.subr.mxu0 %v613_v5  ;;  %579 = vmatpush3.msra.mxu1 %v350_v22 }
  0x2c   :  { %548 = vmatpush3.msra.mxu0 %v254_v8  ;;  %580 = vmatprep.subr.mxu1 %v613_v5 }
  0x2d   :  { %549 = vmatprep.subr.mxu0 %v613_v5  ;;  %581 = vmatpush3.msra.mxu1 %v349_v23 }
  0x2e   :  { %550 = vmatpush3.msra.mxu0 %v253_v9  ;;  %582 = vmatprep.subr.mxu1 %v613_v5 }
  0x2f   :  { %551 = vmatprep.subr.mxu0 %v613_v5  ;;  %583 = vmatpush3.msra.mxu1 %v348_v24 }
  0x30   :  { %552 = vmatpush3.msra.mxu0 %v252_v10  ;;  %584 = vmatprep.subr.mxu1 %v613_v5 }
  0x31   :  { %553 = vmatprep.subr.mxu0 %v613_v5  ;;  %585 = vmatpush3.msra.mxu1 %v347_v25 }
  0x32   :  { %554 = vmatpush3.msra.mxu0 %v251_v11  ;;  %586 = vmatprep.subr.mxu1 %v613_v5 }
  0x33   :  { %555 = vmatprep.subr.mxu0 %v613_v5  ;;  %587 = vmatpush3.msra.mxu1 %v346_v26 }
  0x34   :  { %556 = vmatpush3.msra.mxu0 %v250_v12  ;;  %588 = vmatprep.subr.mxu1 %v613_v5 }
  0x35   :  { %557 = vmatprep.subr.mxu0 %v613_v5  ;;  %589 = vmatpush3.msra.mxu1 %v345_v27 }
  0x36   :  { %558 = vmatpush3.msra.mxu0 %v249_v13  ;;  %590 = vmatprep.subr.mxu1 %v613_v5 }
  0x37   :  { %559 = vmatprep.subr.mxu0 %v613_v5  ;;  %591 = vmatpush3.msra.mxu1 %v344_v28 }
  0x38   :  { %560 = vmatpush3.msra.mxu0 %v248_v14  ;;  %592 = vmatprep.subr.mxu1 %v613_v5 }
  0x39   :  { %561 = vmatprep.subr.mxu0 %v613_v5  ;;  %593 = vmatpush3.msra.mxu1 %v343_v29 }
  0x3a   :  { %562 = vmatpush3.msra.mxu0 %v247_v15  ;;  %594 = vmatprep.subr.mxu1 %v613_v5 }
  0x3b   :  { %563 = vmatprep.subr.mxu0 %v613_v5  ;;  %595 = vmatpush3.msra.mxu1 %v342_v30 }
  0x3c   :  { %564 = vmatpush3.msra.mxu0 %v246_v16  ;;  %596 = vmatprep.subr.mxu1 %v613_v5 }
  0x3d   :  { %565 = vmatprep.subr.mxu0 %v613_v5  ;;  %597 = vmatpush3.msra.mxu1 %v341_v31 }
  0x3e   :  { %566 = vmatpush3.msra.mxu0 %v245_v17  ;;  %598 = vmatprep.subr.mxu1 %v613_v5 }
  0x3f   :  { %567 = vmatprep.subr.mxu0 %v613_v5  ;;  %599 = vmatpush3.msra.mxu1 %v340_v32 }
  0x40   :  { %568 = vmatpush3.msra.mxu0 %v244_v18  ;;  %600 = vmatprep.subr.mxu1 %v613_v5 }
  0x41   :  { %569 = vmatprep.subr.mxu0 %v613_v5  ;;  %601 = vmatpush3.msra.mxu1 %v339_v33 }
  0x42   :  { %570 = vmatpush3.msra.mxu0 %v243_v19  ;;  %602 = vmatprep.subr.mxu1 %v613_v5 }
  0x43   :  { %571 = vmatprep.subr.mxu0 %v613_v5  ;;  %603 = vmatpush3.msra.mxu1 %v338_v44 }
  0x44   :  { %572 = vmatpush3.msra.mxu0 %v242_v20  ;;  %604 = vmatprep.subr.mxu1 %v613_v5 }
  0x45   :  { %605 = vmatpush3.msra.mxu1 %v337_v45 }
  0x46   :  { %606 = vmatprep.subr.mxu1 %v613_v5 }
  0x47   :  { %607 = vmatpush3.msra.mxu1 %v336_v46 }
  0xe4   :  { %v469_v34 = vpop.f32.mrf.mxu0 }
  0xe5   :  { %v504_v35 = vpop.f32.mrf.mxu1 }
  0xe6   :  { %v470_v37 = vpop.f32.mrf.mxu0 }
  0xe7   :  { %v505_v38 = vpop.f32.mrf.mxu1  ;;  %v471_v39 = vadd.f32 %v470_v37, %v469_v34 }
  0xe8   :  { %v506_v41 = vadd.f32 %v505_v38, %v504_v35 }
  0xe9   :  { %v168_v40 = vadd.f32 %v471_v39, %v434_v36 }
  0xeb   :  { %v238_v42 = vadd.f32 %v506_v41, %v168_v40 }
  0xed   :  { %v241_v43 = vmax.f32 %v238_v42, 0.0 }
  0xef   :  { %574 = vmatmul.mubr.f32.vlgmr.msra.gmra.mxu0 %v241_v43 }
 0x1af   :  { %v331_v48 = vpop.f32.mrf.mxu0 }
 0x1b0   :  { %v332_v49 = vadd.f32 %v435_v47, %v331_v48 }
 0x1b1   :  { %v575_v50 = vpop.f32.mrf.mxu0 }
 0x1b2   :  { %v335_v51 = vmax.f32 %v332_v49, 0.0 }
 0x1b4   :  { %609 = vmatmul.mubr.f32.vlgmr.msra.gmra.mxu1 %v335_v51 }
 0x274   :  { %v425_v53 = vpop.f32.mrf.mxu1 }
 0x275   :  { %v426_v54 = vadd.f32 %v436_v52, %v425_v53 }
 0x276   :  { %v610_v55 = vpop.f32.mrf.mxu1 }
 0x277   :  { %429 = vst [vmem:[%s1008_s7] sm:$0xff] %v426_v54 }

</bundles_post_ra>
